<compile_context>
chip_gen: v7x
topology: tpu7x:2x2x1
jax: 0.10.0
libtpu: 0.0.40
codegen_flags: <defaults>
</compile_context>

<pallas_src>
import jax
import jax.numpy as jnp
import numpy as np
from jax import lax
from jax.experimental import pallas as pl
from jax.experimental.pallas import tpu as pltpu


def lstm_recurrence_kernel(xp_ref, whh_t_ref, hlast_ref):
    """Pure LSTM recurrence over time for one batch block (batch on lanes).

    xp_ref:    (T, 4H, Bblk)  precomputed W_ih^T @ x + (b_ih + b_hh), time-major,
                              gates on sublanes, batch on lanes
    whh_t_ref: (4H, H)        recurrent weights, transposed (PyTorch gate order i,f,g,o)
    hlast_ref: (H, Bblk)      output: hidden state after the last time step
    """
    T = xp_ref.shape[0]
    Bblk = xp_ref.shape[2]
    H = whh_t_ref.shape[1]

    def step(t, carry):
        h, c = carry                                           # (H, Bblk) each
        # Only this small H-wide matmul sits on the serial h->h path.
        gates = xp_ref[t] + jnp.dot(whh_t_ref[...], h,
                                    preferred_element_type=jnp.float32)  # (4H, Bblk)
        # H is a multiple of 8 -> each gate slice is a free sublane-aligned view.
        # Gate-wise transcendentals: sigmoid only on i/f/o, tanh only on g.
        i_g = jax.nn.sigmoid(gates[0 * H:1 * H, :])
        f_g = jax.nn.sigmoid(gates[1 * H:2 * H, :])
        g_g = jnp.tanh(gates[2 * H:3 * H, :])
        o_g = jax.nn.sigmoid(gates[3 * H:4 * H, :])
        c_new = f_g * c + i_g * g_g
        h_new = o_g * jnp.tanh(c_new)
        return (h_new, c_new)

    h0 = jnp.zeros((H, Bblk), jnp.float32)
    c0 = jnp.zeros((H, Bblk), jnp.float32)
    # T is small & static here -> fully unrolled straight-line recurrence.
    # TODO(synk): for long sequences chunk the time axis (pltpu.emit_pipeline
    # or an extra "arbitrary" grid axis with h/c in VMEM scratch) instead of a
    # fully-resident slab + full unroll (VMEM / vreg-pressure hazard).
    h_last, _ = lax.fori_loop(0, T, step, (h0, c0), unroll=True)
    hlast_ref[...] = h_last


def t_lstm_forward(tokens, emb_table, w_ih, w_hh, b, w_fc, b_fc, *, b_block=128):
    """Forward pass matching T_LSTM: emb -> LSTM -> fc(last hidden state)."""
    B, T = tokens.shape
    D = emb_table.shape[1]
    H = w_hh.shape[0]
    G = 4 * H

    # Embedding gather directly in TIME-MAJOR order (one activation copy, XLA).
    x_tm = jnp.take(emb_table, tokens.T, axis=0).astype(jnp.float32)   # (T, B, D)

    # Hoisted input projection: one large (T*B, D) @ (D, 4H) matmul + bias.
    x_proj = (x_tm.reshape(T * B, D) @ w_ih + b).reshape(T, B, G)      # (T, B, 4H)

    # Pad batch to the batch block (128 rows -> full MXU / lane occupancy),
    # then re-layout to (n_blocks, T, 4H, b_block):
    #   * gates (4H) on sublanes, batch on lanes
    #   * leading block axis -> each grid block's DMA is one contiguous stream
    B_pad = ((B + b_block - 1) // b_block) * b_block
    if B_pad != B:
        x_proj = jnp.pad(x_proj, ((0, 0), (0, B_pad - B), (0, 0)))
    num_b_blocks = B_pad // b_block
    x_proj = x_proj.reshape(T, num_b_blocks, b_block, G)
    x_proj = jnp.transpose(x_proj, (1, 0, 3, 2))        # (nb, T, 4H, b_block)

    w_hh_t = jnp.transpose(w_hh)                        # (4H, H)

    # Note: W_hh is grid-invariant (constant index_map); at these sizes the
    # default double buffer (16 KiB) is irrelevant, no Buffered(1) needed.
    h_last = pl.pallas_call(
        lstm_recurrence_kernel,
        out_shape=jax.ShapeDtypeStruct((H, B_pad), jnp.float32),
        grid_spec=pltpu.PrefetchScalarGridSpec(
            num_scalar_prefetch=0,
            grid=(num_b_blocks,),
            in_specs=[
                # x_proj slab for this batch block (leading dim squeezed)
                pl.BlockSpec((None, T, G, b_block), lambda bb: (bb, 0, 0, 0)),
                # W_hh^T, grid-invariant
                pl.BlockSpec((G, H), lambda bb: (0, 0)),
            ],
            out_specs=pl.BlockSpec((H, b_block), lambda bb: (0, bb)),
        ),
        compiler_params=pltpu.CompilerParams(
            dimension_semantics=("parallel",)),          # batch blocks independent
    )(x_proj, w_hh_t)

    # Tiny lane-sparse classifier (C=5): keep it in XLA on the last hidden state.
    return jnp.transpose(h_last[:, :B]) @ w_fc + b_fc


def t_lstm_reference(tokens, emb_table, w_ih, w_hh, b, w_fc, b_fc):
    """Pure-JAX reference matching torch.nn.LSTM semantics (gate order i,f,g,o)."""
    x = jnp.take(emb_table, tokens, axis=0)              # (B, T, D)
    B = x.shape[0]
    H = w_hh.shape[0]

    def step(carry, x_t):
        h, c = carry
        gates = x_t @ w_ih + h @ w_hh + b[0]
        i_g = jax.nn.sigmoid(gates[:, 0 * H:1 * H])
        f_g = jax.nn.sigmoid(gates[:, 1 * H:2 * H])
        g_g = jnp.tanh(gates[:, 2 * H:3 * H])
        o_g = jax.nn.sigmoid(gates[:, 3 * H:4 * H])
        c = f_g * c + i_g * g_g
        h = o_g * jnp.tanh(c)
        return (h, c), h

    h0 = jnp.zeros((B, H), jnp.float32)
    c0 = jnp.zeros((B, H), jnp.float32)
    (h_last, _), _ = lax.scan(step, (h0, c0), jnp.transpose(x, (1, 0, 2)))
    return h_last @ w_fc + b_fc


if __name__ == "__main__":
    # Small, deterministic synthetic configuration
    VOCAB = 50          # synthetic vocab standing in for the GloVe table
    D = 200             # input_size == GloVe 6B dim=200
    H = 32              # hidden_size
    C = 5               # num_classes
    B = 2               # batch
    T = 8               # sequence length

    key = jax.random.PRNGKey(0)
    k_emb, k_ih, k_hh, k_b, k_fc, k_bfc, k_tok = jax.random.split(key, 7)

    emb_table = jax.random.normal(k_emb, (VOCAB, D), jnp.float32)
    w_ih = jax.random.normal(k_ih, (D, 4 * H), jnp.float32) * 0.05
    w_hh = jax.random.normal(k_hh, (H, 4 * H), jnp.float32) * 0.05
    b    = jax.random.normal(k_b, (1, 4 * H), jnp.float32) * 0.05   # b_ih + b_hh combined
    w_fc = jax.random.normal(k_fc, (H, C), jnp.float32) * 0.05
    b_fc = jax.random.normal(k_bfc, (1, C), jnp.float32) * 0.05
    tokens = jax.random.randint(k_tok, (B, T), 0, VOCAB, jnp.int32)

    out = jax.block_until_ready(
        t_lstm_forward(tokens, emb_table, w_ih, w_hh, b, w_fc, b_fc))
    ref = jax.block_until_ready(
        t_lstm_reference(tokens, emb_table, w_ih, w_hh, b, w_fc, b_fc))

    assert out.shape == (B, C)
    np.testing.assert_allclose(np.asarray(out), np.asarray(ref),
                               rtol=2e-5, atol=2e-5)
    print("KERNEL_OK")
</pallas_src>

<mosaic_0001>
module attributes {stable_mosaic.version = 11 : i64} {
  func.func @lstm_recurrence_kernel(%arg0: i32, %arg1: memref<1x8x128x128xf32, #tpu.memory_space<vmem>>, %arg2: memref<128x32xf32, #tpu.memory_space<vmem>>, %arg3: memref<32x128xf32, #tpu.memory_space<vmem>>) attributes {dimension_semantics = [#tpu.dimension_semantics<parallel>], iteration_bounds = array<i64: 1>, scalar_prefetch = 0 : i64, scratch_operands = 0 : i64, tpu.core_type = #tpu.core_type<tc>, window_params = [{transform_indices = @transform_0, window_bounds = array<i64: 1, 8, 128, 128>}, {pipeline_mode = #tpu.pipeline_mode<synchronous>, transform_indices = @transform_1, window_bounds = array<i64: 128, 32>}, {transform_indices = @transform_2, window_bounds = array<i64: 32, 128>}]} {
    %cst = arith.constant 0.000000e+00 : f32
    %0 = vector.broadcast %cst : f32 to vector<32x128xf32>
    %cst_0 = arith.constant 0.000000e+00 : f32
    %1 = vector.broadcast %cst_0 : f32 to vector<32x128xf32>
    %c0_i32 = arith.constant 0 : i32
    %c0 = arith.constant 0 : index
    %2 = arith.index_cast %c0_i32 : i32 to index
    %c0_1 = arith.constant 0 : index
    %c0_2 = arith.constant 0 : index
    %3 = vector.load %arg1[%c0, %2, %c0_1, %c0_2] : memref<1x8x128x128xf32, #tpu.memory_space<vmem>>, vector<1x1x128x128xf32>
    %4 = vector.shape_cast %3 : vector<1x1x128x128xf32> to vector<128x128xf32>
    %c0_3 = arith.constant 0 : index
    %c0_4 = arith.constant 0 : index
    %5 = vector.load %arg2[%c0_3, %c0_4] : memref<128x32xf32, #tpu.memory_space<vmem>>, vector<128x32xf32>
    %cst_5 = arith.constant dense<0.000000e+00> : vector<128x128xf32>
    %6 = tpu.matmul %5, %0, %cst_5 {dimension_numbers = #tpu.dot_dimension_numbers<[1], [0], [0], [1], [0, 0, 1, 1], [], []>} : vector<128x32xf32>, vector<32x128xf32>, vector<128x128xf32> -> vector<128x128xf32>
    %7 = arith.addf %4, %6 : vector<128x128xf32>
    %8 = vector.extract_strided_slice %7 {offsets = [0, 0], sizes = [32, 128], strides = [1, 1]} : vector<128x128xf32> to vector<32x128xf32>
    %9 = arith.negf %8 : vector<32x128xf32>
    %10 = math.exp %9 : vector<32x128xf32>
    %cst_6 = arith.constant 1.000000e+00 : f32
    %11 = vector.broadcast %cst_6 : f32 to vector<32x128xf32>
    %12 = arith.addf %11, %10 : vector<32x128xf32>
    %13 = arith.divf %11, %12 : vector<32x128xf32>
    %14 = vector.extract_strided_slice %7 {offsets = [32, 0], sizes = [32, 128], strides = [1, 1]} : vector<128x128xf32> to vector<32x128xf32>
    %15 = arith.negf %14 : vector<32x128xf32>
    %16 = math.exp %15 : vector<32x128xf32>
    %cst_7 = arith.constant 1.000000e+00 : f32
    %17 = vector.broadcast %cst_7 : f32 to vector<32x128xf32>
    %18 = arith.addf %17, %16 : vector<32x128xf32>
    %19 = arith.divf %17, %18 : vector<32x128xf32>
    %20 = vector.extract_strided_slice %7 {offsets = [64, 0], sizes = [32, 128], strides = [1, 1]} : vector<128x128xf32> to vector<32x128xf32>
    %21 = math.tanh %20 : vector<32x128xf32>
    %22 = vector.extract_strided_slice %7 {offsets = [96, 0], sizes = [32, 128], strides = [1, 1]} : vector<128x128xf32> to vector<32x128xf32>
    %23 = arith.negf %22 : vector<32x128xf32>
    %24 = math.exp %23 : vector<32x128xf32>
    %cst_8 = arith.constant 1.000000e+00 : f32
    %25 = vector.broadcast %cst_8 : f32 to vector<32x128xf32>
    %26 = arith.addf %25, %24 : vector<32x128xf32>
    %27 = arith.divf %25, %26 : vector<32x128xf32>
    %28 = arith.mulf %19, %1 : vector<32x128xf32>
    %29 = arith.mulf %13, %21 : vector<32x128xf32>
    %30 = arith.addf %28, %29 : vector<32x128xf32>
    %31 = math.tanh %30 : vector<32x128xf32>
    %32 = arith.mulf %27, %31 : vector<32x128xf32>
    %c1_i32 = arith.constant 1 : i32
    %c0_9 = arith.constant 0 : index
    %33 = arith.index_cast %c1_i32 : i32 to index
    %c0_10 = arith.constant 0 : index
    %c0_11 = arith.constant 0 : index
    %34 = vector.load %arg1[%c0_9, %33, %c0_10, %c0_11] : memref<1x8x128x128xf32, #tpu.memory_space<vmem>>, vector<1x1x128x128xf32>
    %35 = vector.shape_cast %34 : vector<1x1x128x128xf32> to vector<128x128xf32>
    %c0_12 = arith.constant 0 : index
    %c0_13 = arith.constant 0 : index
    %36 = vector.load %arg2[%c0_12, %c0_13] : memref<128x32xf32, #tpu.memory_space<vmem>>, vector<128x32xf32>
    %cst_14 = arith.constant dense<0.000000e+00> : vector<128x128xf32>
    %37 = tpu.matmul %36, %32, %cst_14 {dimension_numbers = #tpu.dot_dimension_numbers<[1], [0], [0], [1], [0, 0, 1, 1], [], []>} : vector<128x32xf32>, vector<32x128xf32>, vector<128x128xf32> -> vector<128x128xf32>
    %38 = arith.addf %35, %37 : vector<128x128xf32>
    %39 = vector.extract_strided_slice %38 {offsets = [0, 0], sizes = [32, 128], strides = [1, 1]} : vector<128x128xf32> to vector<32x128xf32>
    %40 = arith.negf %39 : vector<32x128xf32>
    %41 = math.exp %40 : vector<32x128xf32>
    %cst_15 = arith.constant 1.000000e+00 : f32
    %42 = vector.broadcast %cst_15 : f32 to vector<32x128xf32>
    %43 = arith.addf %42, %41 : vector<32x128xf32>
    %44 = arith.divf %42, %43 : vector<32x128xf32>
    %45 = vector.extract_strided_slice %38 {offsets = [32, 0], sizes = [32, 128], strides = [1, 1]} : vector<128x128xf32> to vector<32x128xf32>
    %46 = arith.negf %45 : vector<32x128xf32>
    %47 = math.exp %46 : vector<32x128xf32>
    %cst_16 = arith.constant 1.000000e+00 : f32
    %48 = vector.broadcast %cst_16 : f32 to vector<32x128xf32>
    %49 = arith.addf %48, %47 : vector<32x128xf32>
    %50 = arith.divf %48, %49 : vector<32x128xf32>
    %51 = vector.extract_strided_slice %38 {offsets = [64, 0], sizes = [32, 128], strides = [1, 1]} : vector<128x128xf32> to vector<32x128xf32>
    %52 = math.tanh %51 : vector<32x128xf32>
    %53 = vector.extract_strided_slice %38 {offsets = [96, 0], sizes = [32, 128], strides = [1, 1]} : vector<128x128xf32> to vector<32x128xf32>
    %54 = arith.negf %53 : vector<32x128xf32>
    %55 = math.exp %54 : vector<32x128xf32>
    %cst_17 = arith.constant 1.000000e+00 : f32
    %56 = vector.broadcast %cst_17 : f32 to vector<32x128xf32>
    %57 = arith.addf %56, %55 : vector<32x128xf32>
    %58 = arith.divf %56, %57 : vector<32x128xf32>
    %59 = arith.mulf %50, %30 : vector<32x128xf32>
    %60 = arith.mulf %44, %52 : vector<32x128xf32>
    %61 = arith.addf %59, %60 : vector<32x128xf32>
    %62 = math.tanh %61 : vector<32x128xf32>
    %63 = arith.mulf %58, %62 : vector<32x128xf32>
    %c2_i32 = arith.constant 2 : i32
    %c0_18 = arith.constant 0 : index
    %64 = arith.index_cast %c2_i32 : i32 to index
    %c0_19 = arith.constant 0 : index
    %c0_20 = arith.constant 0 : index
    %65 = vector.load %arg1[%c0_18, %64, %c0_19, %c0_20] : memref<1x8x128x128xf32, #tpu.memory_space<vmem>>, vector<1x1x128x128xf32>
    %66 = vector.shape_cast %65 : vector<1x1x128x128xf32> to vector<128x128xf32>
    %c0_21 = arith.constant 0 : index
    %c0_22 = arith.constant 0 : index
    %67 = vector.load %arg2[%c0_21, %c0_22] : memref<128x32xf32, #tpu.memory_space<vmem>>, vector<128x32xf32>
    %cst_23 = arith.constant dense<0.000000e+00> : vector<128x128xf32>
    %68 = tpu.matmul %67, %63, %cst_23 {dimension_numbers = #tpu.dot_dimension_numbers<[1], [0], [0], [1], [0, 0, 1, 1], [], []>} : vector<128x32xf32>, vector<32x128xf32>, vector<128x128xf32> -> vector<128x128xf32>
    %69 = arith.addf %66, %68 : vector<128x128xf32>
    %70 = vector.extract_strided_slice %69 {offsets = [0, 0], sizes = [32, 128], strides = [1, 1]} : vector<128x128xf32> to vector<32x128xf32>
    %71 = arith.negf %70 : vector<32x128xf32>
    %72 = math.exp %71 : vector<32x128xf32>
    %cst_24 = arith.constant 1.000000e+00 : f32
    %73 = vector.broadcast %cst_24 : f32 to vector<32x128xf32>
    %74 = arith.addf %73, %72 : vector<32x128xf32>
    %75 = arith.divf %73, %74 : vector<32x128xf32>
    %76 = vector.extract_strided_slice %69 {offsets = [32, 0], sizes = [32, 128], strides = [1, 1]} : vector<128x128xf32> to vector<32x128xf32>
    %77 = arith.negf %76 : vector<32x128xf32>
    %78 = math.exp %77 : vector<32x128xf32>
    %cst_25 = arith.constant 1.000000e+00 : f32
    %79 = vector.broadcast %cst_25 : f32 to vector<32x128xf32>
    %80 = arith.addf %79, %78 : vector<32x128xf32>
    %81 = arith.divf %79, %80 : vector<32x128xf32>
    %82 = vector.extract_strided_slice %69 {offsets = [64, 0], sizes = [32, 128], strides = [1, 1]} : vector<128x128xf32> to vector<32x128xf32>
    %83 = math.tanh %82 : vector<32x128xf32>
    %84 = vector.extract_strided_slice %69 {offsets = [96, 0], sizes = [32, 128], strides = [1, 1]} : vector<128x128xf32> to vector<32x128xf32>
    %85 = arith.negf %84 : vector<32x128xf32>
    %86 = math.exp %85 : vector<32x128xf32>
    %cst_26 = arith.constant 1.000000e+00 : f32
    %87 = vector.broadcast %cst_26 : f32 to vector<32x128xf32>
    %88 = arith.addf %87, %86 : vector<32x128xf32>
    %89 = arith.divf %87, %88 : vector<32x128xf32>
    %90 = arith.mulf %81, %61 : vector<32x128xf32>
    %91 = arith.mulf %75, %83 : vector<32x128xf32>
    %92 = arith.addf %90, %91 : vector<32x128xf32>
    %93 = math.tanh %92 : vector<32x128xf32>
    %94 = arith.mulf %89, %93 : vector<32x128xf32>
    %c3_i32 = arith.constant 3 : i32
    %c0_27 = arith.constant 0 : index
    %95 = arith.index_cast %c3_i32 : i32 to index
    %c0_28 = arith.constant 0 : index
    %c0_29 = arith.constant 0 : index
    %96 = vector.load %arg1[%c0_27, %95, %c0_28, %c0_29] : memref<1x8x128x128xf32, #tpu.memory_space<vmem>>, vector<1x1x128x128xf32>
    %97 = vector.shape_cast %96 : vector<1x1x128x128xf32> to vector<128x128xf32>
    %c0_30 = arith.constant 0 : index
    %c0_31 = arith.constant 0 : index
    %98 = vector.load %arg2[%c0_30, %c0_31] : memref<128x32xf32, #tpu.memory_space<vmem>>, vector<128x32xf32>
    %cst_32 = arith.constant dense<0.000000e+00> : vector<128x128xf32>
    %99 = tpu.matmul %98, %94, %cst_32 {dimension_numbers = #tpu.dot_dimension_numbers<[1], [0], [0], [1], [0, 0, 1, 1], [], []>} : vector<128x32xf32>, vector<32x128xf32>, vector<128x128xf32> -> vector<128x128xf32>
    %100 = arith.addf %97, %99 : vector<128x128xf32>
    %101 = vector.extract_strided_slice %100 {offsets = [0, 0], sizes = [32, 128], strides = [1, 1]} : vector<128x128xf32> to vector<32x128xf32>
    %102 = arith.negf %101 : vector<32x128xf32>
    %103 = math.exp %102 : vector<32x128xf32>
    %cst_33 = arith.constant 1.000000e+00 : f32
    %104 = vector.broadcast %cst_33 : f32 to vector<32x128xf32>
    %105 = arith.addf %104, %103 : vector<32x128xf32>
    %106 = arith.divf %104, %105 : vector<32x128xf32>
    %107 = vector.extract_strided_slice %100 {offsets = [32, 0], sizes = [32, 128], strides = [1, 1]} : vector<128x128xf32> to vector<32x128xf32>
    %108 = arith.negf %107 : vector<32x128xf32>
    %109 = math.exp %108 : vector<32x128xf32>
    %cst_34 = arith.constant 1.000000e+00 : f32
    %110 = vector.broadcast %cst_34 : f32 to vector<32x128xf32>
    %111 = arith.addf %110, %109 : vector<32x128xf32>
    %112 = arith.divf %110, %111 : vector<32x128xf32>
    %113 = vector.extract_strided_slice %100 {offsets = [64, 0], sizes = [32, 128], strides = [1, 1]} : vector<128x128xf32> to vector<32x128xf32>
    %114 = math.tanh %113 : vector<32x128xf32>
    %115 = vector.extract_strided_slice %100 {offsets = [96, 0], sizes = [32, 128], strides = [1, 1]} : vector<128x128xf32> to vector<32x128xf32>
    %116 = arith.negf %115 : vector<32x128xf32>
    %117 = math.exp %116 : vector<32x128xf32>
    %cst_35 = arith.constant 1.000000e+00 : f32
    %118 = vector.broadcast %cst_35 : f32 to vector<32x128xf32>
    %119 = arith.addf %118, %117 : vector<32x128xf32>
    %120 = arith.divf %118, %119 : vector<32x128xf32>
    %121 = arith.mulf %112, %92 : vector<32x128xf32>
    %122 = arith.mulf %106, %114 : vector<32x128xf32>
    %123 = arith.addf %121, %122 : vector<32x128xf32>
    %124 = math.tanh %123 : vector<32x128xf32>
    %125 = arith.mulf %120, %124 : vector<32x128xf32>
    %c4_i32 = arith.constant 4 : i32
    %c0_36 = arith.constant 0 : index
    %126 = arith.index_cast %c4_i32 : i32 to index
    %c0_37 = arith.constant 0 : index
    %c0_38 = arith.constant 0 : index
    %127 = vector.load %arg1[%c0_36, %126, %c0_37, %c0_38] : memref<1x8x128x128xf32, #tpu.memory_space<vmem>>, vector<1x1x128x128xf32>
    %128 = vector.shape_cast %127 : vector<1x1x128x128xf32> to vector<128x128xf32>
    %c0_39 = arith.constant 0 : index
    %c0_40 = arith.constant 0 : index
    %129 = vector.load %arg2[%c0_39, %c0_40] : memref<128x32xf32, #tpu.memory_space<vmem>>, vector<128x32xf32>
    %cst_41 = arith.constant dense<0.000000e+00> : vector<128x128xf32>
    %130 = tpu.matmul %129, %125, %cst_41 {dimension_numbers = #tpu.dot_dimension_numbers<[1], [0], [0], [1], [0, 0, 1, 1], [], []>} : vector<128x32xf32>, vector<32x128xf32>, vector<128x128xf32> -> vector<128x128xf32>
    %131 = arith.addf %128, %130 : vector<128x128xf32>
    %132 = vector.extract_strided_slice %131 {offsets = [0, 0], sizes = [32, 128], strides = [1, 1]} : vector<128x128xf32> to vector<32x128xf32>
    %133 = arith.negf %132 : vector<32x128xf32>
    %134 = math.exp %133 : vector<32x128xf32>
    %cst_42 = arith.constant 1.000000e+00 : f32
    %135 = vector.broadcast %cst_42 : f32 to vector<32x128xf32>
    %136 = arith.addf %135, %134 : vector<32x128xf32>
    %137 = arith.divf %135, %136 : vector<32x128xf32>
    %138 = vector.extract_strided_slice %131 {offsets = [32, 0], sizes = [32, 128], strides = [1, 1]} : vector<128x128xf32> to vector<32x128xf32>
    %139 = arith.negf %138 : vector<32x128xf32>
    %140 = math.exp %139 : vector<32x128xf32>
    %cst_43 = arith.constant 1.000000e+00 : f32
    %141 = vector.broadcast %cst_43 : f32 to vector<32x128xf32>
    %142 = arith.addf %141, %140 : vector<32x128xf32>
    %143 = arith.divf %141, %142 : vector<32x128xf32>
    %144 = vector.extract_strided_slice %131 {offsets = [64, 0], sizes = [32, 128], strides = [1, 1]} : vector<128x128xf32> to vector<32x128xf32>
    %145 = math.tanh %144 : vector<32x128xf32>
    %146 = vector.extract_strided_slice %131 {offsets = [96, 0], sizes = [32, 128], strides = [1, 1]} : vector<128x128xf32> to vector<32x128xf32>
    %147 = arith.negf %146 : vector<32x128xf32>
    %148 = math.exp %147 : vector<32x128xf32>
    %cst_44 = arith.constant 1.000000e+00 : f32
    %149 = vector.broadcast %cst_44 : f32 to vector<32x128xf32>
    %150 = arith.addf %149, %148 : vector<32x128xf32>
    %151 = arith.divf %149, %150 : vector<32x128xf32>
    %152 = arith.mulf %143, %123 : vector<32x128xf32>
    %153 = arith.mulf %137, %145 : vector<32x128xf32>
    %154 = arith.addf %152, %153 : vector<32x128xf32>
    %155 = math.tanh %154 : vector<32x128xf32>
    %156 = arith.mulf %151, %155 : vector<32x128xf32>
    %c5_i32 = arith.constant 5 : i32
    %c0_45 = arith.constant 0 : index
    %157 = arith.index_cast %c5_i32 : i32 to index
    %c0_46 = arith.constant 0 : index
    %c0_47 = arith.constant 0 : index
    %158 = vector.load %arg1[%c0_45, %157, %c0_46, %c0_47] : memref<1x8x128x128xf32, #tpu.memory_space<vmem>>, vector<1x1x128x128xf32>
    %159 = vector.shape_cast %158 : vector<1x1x128x128xf32> to vector<128x128xf32>
    %c0_48 = arith.constant 0 : index
    %c0_49 = arith.constant 0 : index
    %160 = vector.load %arg2[%c0_48, %c0_49] : memref<128x32xf32, #tpu.memory_space<vmem>>, vector<128x32xf32>
    %cst_50 = arith.constant dense<0.000000e+00> : vector<128x128xf32>
    %161 = tpu.matmul %160, %156, %cst_50 {dimension_numbers = #tpu.dot_dimension_numbers<[1], [0], [0], [1], [0, 0, 1, 1], [], []>} : vector<128x32xf32>, vector<32x128xf32>, vector<128x128xf32> -> vector<128x128xf32>
    %162 = arith.addf %159, %161 : vector<128x128xf32>
    %163 = vector.extract_strided_slice %162 {offsets = [0, 0], sizes = [32, 128], strides = [1, 1]} : vector<128x128xf32> to vector<32x128xf32>
    %164 = arith.negf %163 : vector<32x128xf32>
    %165 = math.exp %164 : vector<32x128xf32>
    %cst_51 = arith.constant 1.000000e+00 : f32
    %166 = vector.broadcast %cst_51 : f32 to vector<32x128xf32>
    %167 = arith.addf %166, %165 : vector<32x128xf32>
    %168 = arith.divf %166, %167 : vector<32x128xf32>
    %169 = vector.extract_strided_slice %162 {offsets = [32, 0], sizes = [32, 128], strides = [1, 1]} : vector<128x128xf32> to vector<32x128xf32>
    %170 = arith.negf %169 : vector<32x128xf32>
    %171 = math.exp %170 : vector<32x128xf32>
    %cst_52 = arith.constant 1.000000e+00 : f32
    %172 = vector.broadcast %cst_52 : f32 to vector<32x128xf32>
    %173 = arith.addf %172, %171 : vector<32x128xf32>
    %174 = arith.divf %172, %173 : vector<32x128xf32>
    %175 = vector.extract_strided_slice %162 {offsets = [64, 0], sizes = [32, 128], strides = [1, 1]} : vector<128x128xf32> to vector<32x128xf32>
    %176 = math.tanh %175 : vector<32x128xf32>
    %177 = vector.extract_strided_slice %162 {offsets = [96, 0], sizes = [32, 128], strides = [1, 1]} : vector<128x128xf32> to vector<32x128xf32>
    %178 = arith.negf %177 : vector<32x128xf32>
    %179 = math.exp %178 : vector<32x128xf32>
    %cst_53 = arith.constant 1.000000e+00 : f32
    %180 = vector.broadcast %cst_53 : f32 to vector<32x128xf32>
    %181 = arith.addf %180, %179 : vector<32x128xf32>
    %182 = arith.divf %180, %181 : vector<32x128xf32>
    %183 = arith.mulf %174, %154 : vector<32x128xf32>
    %184 = arith.mulf %168, %176 : vector<32x128xf32>
    %185 = arith.addf %183, %184 : vector<32x128xf32>
    %186 = math.tanh %185 : vector<32x128xf32>
    %187 = arith.mulf %182, %186 : vector<32x128xf32>
    %c6_i32 = arith.constant 6 : i32
    %c0_54 = arith.constant 0 : index
    %188 = arith.index_cast %c6_i32 : i32 to index
    %c0_55 = arith.constant 0 : index
    %c0_56 = arith.constant 0 : index
    %189 = vector.load %arg1[%c0_54, %188, %c0_55, %c0_56] : memref<1x8x128x128xf32, #tpu.memory_space<vmem>>, vector<1x1x128x128xf32>
    %190 = vector.shape_cast %189 : vector<1x1x128x128xf32> to vector<128x128xf32>
    %c0_57 = arith.constant 0 : index
    %c0_58 = arith.constant 0 : index
    %191 = vector.load %arg2[%c0_57, %c0_58] : memref<128x32xf32, #tpu.memory_space<vmem>>, vector<128x32xf32>
    %cst_59 = arith.constant dense<0.000000e+00> : vector<128x128xf32>
    %192 = tpu.matmul %191, %187, %cst_59 {dimension_numbers = #tpu.dot_dimension_numbers<[1], [0], [0], [1], [0, 0, 1, 1], [], []>} : vector<128x32xf32>, vector<32x128xf32>, vector<128x128xf32> -> vector<128x128xf32>
    %193 = arith.addf %190, %192 : vector<128x128xf32>
    %194 = vector.extract_strided_slice %193 {offsets = [0, 0], sizes = [32, 128], strides = [1, 1]} : vector<128x128xf32> to vector<32x128xf32>
    %195 = arith.negf %194 : vector<32x128xf32>
    %196 = math.exp %195 : vector<32x128xf32>
    %cst_60 = arith.constant 1.000000e+00 : f32
    %197 = vector.broadcast %cst_60 : f32 to vector<32x128xf32>
    %198 = arith.addf %197, %196 : vector<32x128xf32>
    %199 = arith.divf %197, %198 : vector<32x128xf32>
    %200 = vector.extract_strided_slice %193 {offsets = [32, 0], sizes = [32, 128], strides = [1, 1]} : vector<128x128xf32> to vector<32x128xf32>
    %201 = arith.negf %200 : vector<32x128xf32>
    %202 = math.exp %201 : vector<32x128xf32>
    %cst_61 = arith.constant 1.000000e+00 : f32
    %203 = vector.broadcast %cst_61 : f32 to vector<32x128xf32>
    %204 = arith.addf %203, %202 : vector<32x128xf32>
    %205 = arith.divf %203, %204 : vector<32x128xf32>
    %206 = vector.extract_strided_slice %193 {offsets = [64, 0], sizes = [32, 128], strides = [1, 1]} : vector<128x128xf32> to vector<32x128xf32>
    %207 = math.tanh %206 : vector<32x128xf32>
    %208 = vector.extract_strided_slice %193 {offsets = [96, 0], sizes = [32, 128], strides = [1, 1]} : vector<128x128xf32> to vector<32x128xf32>
    %209 = arith.negf %208 : vector<32x128xf32>
    %210 = math.exp %209 : vector<32x128xf32>
    %cst_62 = arith.constant 1.000000e+00 : f32
    %211 = vector.broadcast %cst_62 : f32 to vector<32x128xf32>
    %212 = arith.addf %211, %210 : vector<32x128xf32>
    %213 = arith.divf %211, %212 : vector<32x128xf32>
    %214 = arith.mulf %205, %185 : vector<32x128xf32>
    %215 = arith.mulf %199, %207 : vector<32x128xf32>
    %216 = arith.addf %214, %215 : vector<32x128xf32>
    %217 = math.tanh %216 : vector<32x128xf32>
    %218 = arith.mulf %213, %217 : vector<32x128xf32>
    %c7_i32 = arith.constant 7 : i32
    %c0_63 = arith.constant 0 : index
    %219 = arith.index_cast %c7_i32 : i32 to index
    %c0_64 = arith.constant 0 : index
    %c0_65 = arith.constant 0 : index
    %220 = vector.load %arg1[%c0_63, %219, %c0_64, %c0_65] : memref<1x8x128x128xf32, #tpu.memory_space<vmem>>, vector<1x1x128x128xf32>
    %221 = vector.shape_cast %220 : vector<1x1x128x128xf32> to vector<128x128xf32>
    %c0_66 = arith.constant 0 : index
    %c0_67 = arith.constant 0 : index
    %222 = vector.load %arg2[%c0_66, %c0_67] : memref<128x32xf32, #tpu.memory_space<vmem>>, vector<128x32xf32>
    %cst_68 = arith.constant dense<0.000000e+00> : vector<128x128xf32>
    %223 = tpu.matmul %222, %218, %cst_68 {dimension_numbers = #tpu.dot_dimension_numbers<[1], [0], [0], [1], [0, 0, 1, 1], [], []>} : vector<128x32xf32>, vector<32x128xf32>, vector<128x128xf32> -> vector<128x128xf32>
    %224 = arith.addf %221, %223 : vector<128x128xf32>
    %225 = vector.extract_strided_slice %224 {offsets = [0, 0], sizes = [32, 128], strides = [1, 1]} : vector<128x128xf32> to vector<32x128xf32>
    %226 = arith.negf %225 : vector<32x128xf32>
    %227 = math.exp %226 : vector<32x128xf32>
    %cst_69 = arith.constant 1.000000e+00 : f32
    %228 = vector.broadcast %cst_69 : f32 to vector<32x128xf32>
    %229 = arith.addf %228, %227 : vector<32x128xf32>
    %230 = arith.divf %228, %229 : vector<32x128xf32>
    %231 = vector.extract_strided_slice %224 {offsets = [32, 0], sizes = [32, 128], strides = [1, 1]} : vector<128x128xf32> to vector<32x128xf32>
    %232 = arith.negf %231 : vector<32x128xf32>
    %233 = math.exp %232 : vector<32x128xf32>
    %cst_70 = arith.constant 1.000000e+00 : f32
    %234 = vector.broadcast %cst_70 : f32 to vector<32x128xf32>
    %235 = arith.addf %234, %233 : vector<32x128xf32>
    %236 = arith.divf %234, %235 : vector<32x128xf32>
    %237 = vector.extract_strided_slice %224 {offsets = [64, 0], sizes = [32, 128], strides = [1, 1]} : vector<128x128xf32> to vector<32x128xf32>
    %238 = math.tanh %237 : vector<32x128xf32>
    %239 = vector.extract_strided_slice %224 {offsets = [96, 0], sizes = [32, 128], strides = [1, 1]} : vector<128x128xf32> to vector<32x128xf32>
    %240 = arith.negf %239 : vector<32x128xf32>
    %241 = math.exp %240 : vector<32x128xf32>
    %cst_71 = arith.constant 1.000000e+00 : f32
    %242 = vector.broadcast %cst_71 : f32 to vector<32x128xf32>
    %243 = arith.addf %242, %241 : vector<32x128xf32>
    %244 = arith.divf %242, %243 : vector<32x128xf32>
    %245 = arith.mulf %236, %216 : vector<32x128xf32>
    %246 = arith.mulf %230, %238 : vector<32x128xf32>
    %247 = arith.addf %245, %246 : vector<32x128xf32>
    %248 = math.tanh %247 : vector<32x128xf32>
    %249 = arith.mulf %244, %248 : vector<32x128xf32>
    %c8_i32 = arith.constant 8 : i32
    %c0_72 = arith.constant 0 : index
    %c0_73 = arith.constant 0 : index
    %250 = vector.load %arg3[%c0_72, %c0_73] : memref<32x128xf32, #tpu.memory_space<vmem>>, vector<32x128xf32>
    tpu.vector_store %arg3[%c0_72, %c0_73], %249 {strides = array<i32>} : memref<32x128xf32, #tpu.memory_space<vmem>>, vector<32x128xf32>,
    return
  }
  func.func @transform_0(%arg0: i32) -> (i32, i32, i32, i32) {
    %c0_i32 = arith.constant 0 : i32
    %c0_i32_0 = arith.constant 0 : i32
    %c0_i32_1 = arith.constant 0 : i32
    %c0_i32_2 = arith.constant 0 : i32
    return %arg0, %c0_i32, %c0_i32_0, %c0_i32_1 : i32, i32, i32, i32
  }
  func.func @transform_1(%arg0: i32) -> (i32, i32) {
    %c0_i32 = arith.constant 0 : i32
    %c0_i32_0 = arith.constant 0 : i32
    %c0_i32_1 = arith.constant 0 : i32
    return %c0_i32, %c0_i32_0 : i32, i32
  }
  func.func @transform_2(%arg0: i32) -> (i32, i32) {
    %c0_i32 = arith.constant 0 : i32
    %c0_i32_0 = arith.constant 0 : i32
    return %c0_i32, %arg0 : i32, i32
  }
}

</mosaic_0001>

<bundles_post_ra>
// kernel: tpu_custom_call.1
= control target key start
LH: loop header
LB: loop body
LE: loop exit
PB: predicated region body
PF: predicated region fallthrough
CT: control target
= control target key end

     0   :  { %7 = vsyncpa [#allocation3], 0  ;;  %s4239_s0 = inlined_call_operand.hbm [shape: f32[1,8,128,128], index: 0, kind: input, shape index: {}]   ;;  %s4240_s1 = inlined_call_operand.vmem [shape: f32[128,32], index: 1, kind: input, shape index: {}]   ;;  %s4241_s2 = inlined_call_operand.hbm [shape: f32[32,128], index: 2, kind: output, shape index: {}]  }
   0x1   :  { %8 = vsyncpa [#allocation4], 0  ;;  %s3586_s9 = smov [#allocation2]   ;;  %s3538_s13 = scalar_lea.hbm %s4239_s0, 16384 }
   0x2   :  { %s14_s10 = sshll.u32 %s3586_s9, 4  ;;  %p3539_p0 = scmp.ne.s32.totalorder %s4239_s0, %s3538_s13  ;;  %s15_s10 = int_to_ptr.vmem [resolvable:$true] %s14_s10 }
   0x3   :  { %p3542_p1 = scmp.lt.u32.totalorder %s3538_s13, %s4239_s0 }
   0x5   :  { %p3544_p2 = pnand %p3542_p1, %p3539_p0 }
   0x7   :  { %3547 = shalt.err (!%p3544_p2)
}
   0x8   :  { %s3548_s18 = scalar_lea.vmem %s15_s10, 16384  ;;  %p3553_p4 = scmp.lt.s32.totalorder %s15_s10, %s15_s10 }
   0x9   :  { %p3549_p3 = scmp.ne.s32.totalorder %s15_s10, %s3548_s18  ;;  %p3554_p5 = scmp.lt.s32.totalorder %s3548_s18, %s3548_s18 }
   0xb   :  { %p3555_p6 = por %p3554_p5, %p3553_p4 }
   0xd   :  { %p3556_p7 = pnand %p3555_p6, %p3549_p3 }
   0xf   :  { %3559 = shalt.err (!%p3556_p7)
}
  0x10   :  { %s3587_s19 = smov 128   ;;  %s3588_s20 = smov 8  }
  0x11   :  { %20 = dma.hbm_to_vmem [thread:$0]  %s4239_s0, 16384, %s15_s10, [#allocation3], %s3587_s19, %s3587_s19, %s3588_s20  }
  0x12   :  { %3582 = dma.done.wait [#allocation3], 16384  }
  0x13   :  { %3583 = vsyncadd [#allocation3], 4294950912  ;;  %v3589_v0 = vmov 0.0   ;;  %vm58_vm0 = vcmask 261120   ;;  %v3624_v1 = vld [vmem:[%s4240_s1] sm:$0xff]  ;;  %v3629_v2 = vld [vmem:[%s4240_s1 + $0x8] sm:$0xff] }
  0x14   :  { %2684 = vmatprep.subr.mxu0 %v3589_v0  ;;  %v3634_v3 = vld [vmem:[%s4240_s1 + $0x10] sm:$0xff]  ;;  %2686 = vmatprep.mubr.msk.f32.mxu0 %vm58_vm0, %v3624_v1  ;;  %v3647_v4 = vld [vmem:[%s4240_s1 + $0x18] sm:$0xff]  ;;  %v3652_v5 = vld [vmem:[%s4240_s1 + $0x20] sm:$0xff] }
  0x15   :  { %2685 = vmatpush3.msra.mxu0 %v3589_v0  ;;  %2718 = vmatprep.mubr.msk.f32.mxu1 %vm58_vm0, %v3624_v1  ;;  %v3661_v6 = vld [vmem:[%s4240_s1 + $0x28] sm:$0xff]  ;;  %v3666_v7 = vld [vmem:[%s4240_s1 + $0x30] sm:$0xff]  ;;  %v3675_v8 = vld [vmem:[%s4240_s1 + $0x38] sm:$0xff] }
  0x16   :  { %2687 = vmatmul.mubr.msk.f32.vlgmr.msra.gmra.mrb[0].mxu0 %vm58_vm0, %v3629_v2  ;;  %v3680_v9 = vld [vmem:[%s4240_s1 + $0x40] sm:$0xff]  ;;  %v3689_v10 = vld [vmem:[%s4240_s1 + $0x48] sm:$0xff]  ;;  %v3694_v11 = vld [vmem:[%s4240_s1 + $0x50] sm:$0xff] }
  0x17   :  { %2689 = vmatprep.mubr.msk.f32.mxu0 %vm58_vm0, %v3634_v3  ;;  %v3703_v12 = vld [vmem:[%s4240_s1 + $0x58] sm:$0xff]  ;;  %v3708_v13 = vld [vmem:[%s4240_s1 + $0x60] sm:$0xff]  ;;  %v3717_v14 = vld [vmem:[%s4240_s1 + $0x68] sm:$0xff] }
  0x18   :  { %v3722_v15 = vld [vmem:[%s4240_s1 + $0x70] sm:$0xff]  ;;  %v3731_v16 = vld [vmem:[%s4240_s1 + $0x78] sm:$0xff]  ;;  %v27_v17 = vld [vmem:[#allocation2 + $0x8] sm:$0xff] }
  0x19   :  { %v26_v18 = vld [vmem:[#allocation2] sm:$0xff]  ;;  %v29_v23 = vld [vmem:[#allocation2 + $0x18] sm:$0xff]  ;;  %v28_v25 = vld [vmem:[#allocation2 + $0x10] sm:$0xff] }
  0x1a   :  { %2690 = vmatmul.mubr.msk.f32.gmra.mrb[2].mxu0 %vm58_vm0, %v3647_v4  ;;  %v31_v31 = vld [vmem:[#allocation2 + $0x28] sm:$0xff]  ;;  %v30_v33 = vld [vmem:[#allocation2 + $0x20] sm:$0xff]  ;;  %v33_v39 = vld [vmem:[#allocation2 + $0x38] sm:$0xff] }
  0x1b   :  { %2692 = vmatprep.mubr.msk.f32.mxu0 %vm58_vm0, %v3652_v5  ;;  %v32_v41 = vld [vmem:[#allocation2 + $0x30] sm:$0xff]  ;;  %v35_v47 = vld [vmem:[#allocation2 + $0x48] sm:$0xff]  ;;  %v34_v56 = vld [vmem:[#allocation2 + $0x40] sm:$0xff] }
  0x1c   :  { %v37_v58 = vld [vmem:[#allocation2 + $0x58] sm:$0xff] }
  0x1e   :  { %2693 = vmatmul.mubr.msk.f32.gmra.mrb[4].mxu0 %vm58_vm0, %v3661_v6 }
  0x1f   :  { %2695 = vmatprep.mubr.msk.f32.mxu0 %vm58_vm0, %v3666_v7 }
  0x22   :  { %2696 = vmatmul.mubr.msk.f32.gmra.mrb[6].mxu0 %vm58_vm0, %v3675_v8 }
  0x23   :  { %2698 = vmatprep.mubr.msk.f32.mxu0 %vm58_vm0, %v3680_v9 }
  0x26   :  { %2699 = vmatmul.mubr.msk.f32.gmra.mrb[8].mxu0 %vm58_vm0, %v3689_v10 }
  0x27   :  { %2701 = vmatprep.mubr.msk.f32.mxu0 %vm58_vm0, %v3694_v11 }
  0x2a   :  { %2702 = vmatmul.mubr.msk.f32.gmra.mrb[10].mxu0 %vm58_vm0, %v3703_v12 }
  0x2b   :  { %2704 = vmatprep.mubr.msk.f32.mxu0 %vm58_vm0, %v3708_v13 }
  0x2e   :  { %2705 = vmatmul.mubr.msk.f32.gmra.mrb[12].mxu0 %vm58_vm0, %v3717_v14 }
  0x2f   :  { %2707 = vmatprep.mubr.msk.f32.mxu0 %vm58_vm0, %v3722_v15 }
  0x32   :  { %2708 = vmatmul.mubr.msk.f32.gmra.mrb[14].mxu0 %vm58_vm0, %v3731_v16 }
  0x33   :  { %2750 = vmatprep.mubr.msk.f32.mxu0 %vm58_vm0, %v3624_v1 }
  0xe9   :  { %v2688_v19 = vpop.f32.mrb[0].mxu0 }
  0xea   :  { %v253_v20 = vadd.f32 %v2688_v19, %v27_v17  ;;  %v173_v21 = vpop.f32.mrb[1].mxu0 }
  0xeb   :  { %v252_v22 = vadd.f32 %v173_v21, %v26_v18  ;;  %v36_v18 = vld [vmem:[#allocation2 + $0x50] sm:$0xff] }
  0xec   :  { %v2320_v24 = vmul.f32 -1.442695, %v253_v20  ;;  %v39_v20 = vld [vmem:[#allocation2 + $0x68] sm:$0xff] }
  0xed   :  { %v2319_v26 = vmul.f32 -1.442695, %v252_v22  ;;  %v2691_v27 = vpop.f32.mrb[2].mxu0  ;;  %v38_v22 = vld [vmem:[#allocation2 + $0x60] sm:$0xff] }
  0xee   :  { %2995 = vpow2.f32 %v2320_v24  ;;  %v255_v28 = vadd.f32 %v2691_v27, %v29_v23  ;;  %v183_v29 = vpop.f32.mrb[3].mxu0 }
  0xef   :  { %2997 = vpow2.f32 %v2319_v26  ;;  %v254_v30 = vadd.f32 %v183_v29, %v28_v25 }
  0xf0   :  { %v2322_v32 = vmul.f32 -1.442695, %v255_v28 }
  0xf1   :  { %v2321_v34 = vmul.f32 -1.442695, %v254_v30  ;;  %v2694_v35 = vpop.f32.mrb[4].mxu0 }
  0xf2   :  { %2999 = vpow2.f32 %v2322_v32  ;;  %v257_v36 = vadd.f32 %v2694_v35, %v31_v31  ;;  %v193_v37 = vpop.f32.mrb[5].mxu0  ;;  %v41_v31 = vld [vmem:[#allocation2 + $0x78] sm:$0xff] }
  0xf3   :  { %3001 = vpow2.f32 %v2321_v34  ;;  %v256_v38 = vadd.f32 %v193_v37, %v30_v33  ;;  %v40_v34 = vld [vmem:[#allocation2 + $0x70] sm:$0xff] }
  0xf4   :  { %v2324_v40 = vmul.f32 -1.442695, %v257_v36 }
  0xf5   :  { %v2323_v42 = vmul.f32 -1.442695, %v256_v38  ;;  %v2697_v43 = vpop.f32.mrb[6].mxu0 }
  0xf6   :  { %3003 = vpow2.f32 %v2324_v40  ;;  %v259_v44 = vadd.f32 %v2697_v43, %v33_v39  ;;  %v203_v45 = vpop.f32.mrb[7].mxu0 }
  0xf7   :  { %3005 = vpow2.f32 %v2323_v42  ;;  %v258_v46 = vadd.f32 %v203_v45, %v32_v41 }
  0xf8   :  { %v2996_v48 = vpop.eup %2995  ;;  %v2326_v49 = vmul.f32 -1.442695, %v259_v44 }
  0xf9   :  { %v2998_v50 = vpop.eup %2997  ;;  %v281_v51 = vadd.f32 1.0, %v2996_v48  ;;  %v2325_v52 = vmul.f32 -1.442695, %v258_v46  ;;  %v2700_v53 = vpop.f32.mrb[8].mxu0 }
  0xfa   :  { %v280_v54 = vadd.f32 1.0, %v2998_v50  ;;  %3007 = vpow2.f32 %v2326_v49  ;;  %v261_v55 = vadd.f32 %v2700_v53, %v35_v47  ;;  %v213_v57 = vpop.f32.mrb[9].mxu0 }
  0xfb   :  { %3009 = vrcp.f32 %v281_v51  ;;  %v260_v62 = vadd.f32 %v213_v57, %v34_v56 }
  0xfc   :  { %v3000_v59 = vpop.eup %2999  ;;  %3011 = vrcp.f32 %v280_v54 }
  0xfd   :  { %v3002_v60 = vpop.eup %3001  ;;  %v283_v61 = vadd.f32 1.0, %v3000_v59  ;;  %3013 = vpow2.f32 %v2325_v52  ;;  %v2703_v63 = vpop.f32.mrb[10].mxu0 }
  0xfe   :  { %v282_v0 = vadd.f32 1.0, %v3002_v60  ;;  %3015 = vtanh.f32 %v261_v55  ;;  %v263_v17 = vadd.f32 %v2703_v63, %v37_v58  ;;  %v223_v19 = vpop.f32.mrb[11].mxu0 }
  0xff   :  { %3017 = vrcp.f32 %v283_v61  ;;  %v262_v25 = vadd.f32 %v223_v19, %v36_v18 }
 0x100   :  { %v3004_v21 = vpop.eup %3003  ;;  %3019 = vrcp.f32 %v282_v0 }
 0x101   :  { %v3006_v23 = vpop.eup %3005  ;;  %v305_v24 = vadd.f32 1.0, %v3004_v21  ;;  %3021 = vtanh.f32 %v260_v62  ;;  %v2706_v26 = vpop.f32.mrb[12].mxu0 }
 0x102   :  { %v304_v27 = vadd.f32 1.0, %v3006_v23  ;;  %3023 = vtanh.f32 %v263_v17  ;;  %v265_v28 = vadd.f32 %v2706_v26, %v39_v20  ;;  %v233_v29 = vpop.f32.mrb[13].mxu0 }
 0x103   :  { %3025 = vrcp.f32 %v305_v24  ;;  %v264_v30 = vadd.f32 %v233_v29, %v38_v22 }
 0x104   :  { %v3008_v32 = vpop.eup %3007  ;;  %3027 = vrcp.f32 %v304_v27  ;;  %v2328_v33 = vmul.f32 -1.442695, %v265_v28 }
 0x105   :  { %v3010_v35 = vpop.eup %3009  ;;  %v307_v36 = vadd.f32 1.0, %v3008_v32  ;;  %3029 = vtanh.f32 %v262_v25  ;;  %v2327_v37 = vmul.f32 -1.442695, %v264_v30  ;;  %v2709_v38 = vpop.f32.mrb[14].mxu0 }
 0x106   :  { %v3012_v39 = vpop.eup %3011  ;;  %3031 = vpow2.f32 %v2328_v33  ;;  %v267_v40 = vadd.f32 %v2709_v38, %v41_v31  ;;  %v243_v41 = vpop.f32.mrb[15].mxu0 }
 0x107   :  { %v3014_v42 = vpop.eup %3013  ;;  %3033 = vrcp.f32 %v307_v36  ;;  %v266_v43 = vadd.f32 %v243_v41, %v40_v34 }
 0x108   :  { %v3016_v44 = vpop.eup %3015  ;;  %v306_v45 = vadd.f32 1.0, %v3014_v42  ;;  %3035 = vpow2.f32 %v2327_v37  ;;  %v2330_v46 = vmul.f32 -1.442695, %v267_v40 }
 0x109   :  { %v3018_v47 = vpop.eup %3017  ;;  %v349_v48 = vmul.f32 %v3016_v44, %v3010_v35  ;;  %v2329_v49 = vmul.f32 -1.442695, %v266_v43  ;;  %v366_v43 = vld [vmem:[#allocation2 + $0x88] sm:$0xff]  ;;  %v365_v44 = vld [vmem:[#allocation2 + $0x80] sm:$0xff] }
 0x10a   :  { %v3020_v50 = vpop.eup %3019  ;;  %3037 = vrcp.f32 %v306_v45 }
 0x10b   :  { %v3022_v51 = vpop.eup %3021  ;;  %3039 = vpow2.f32 %v2330_v46 }
 0x10c   :  { %v3024_v52 = vpop.eup %3023  ;;  %v348_v53 = vmul.f32 %v3022_v51, %v3012_v39  ;;  %3041 = vpow2.f32 %v2329_v49  ;;  %v368_v49 = vld [vmem:[#allocation2 + $0x98] sm:$0xff]  ;;  %v367_v51 = vld [vmem:[#allocation2 + $0x90] sm:$0xff] }
 0x10d   :  { %v3026_v54 = vpop.eup %3025  ;;  %v351_v55 = vmul.f32 %v3024_v52, %v3018_v47 }
 0x10e   :  { %v3028_v56 = vpop.eup %3027  ;;  %v345_v57 = vmul.f32 0.0, %v3026_v54 }
 0x10f   :  { %v3030_v58 = vpop.eup %3029  ;;  %v344_v59 = vmul.f32 0.0, %v3028_v56 }
 0x110   :  { %v3032_v60 = vpop.eup %3031  ;;  %v3737_v61 = vadd.f32 %v349_v48, %v345_v57  ;;  %v350_v62 = vmul.f32 %v3030_v58, %v3020_v50  ;;  %v370_v57 = vld [vmem:[#allocation2 + $0xa8] sm:$0xff] }
 0x111   :  { %v3034_v63 = vpop.eup %3033  ;;  %v3739_v0 = vadd.f32 %v348_v53, %v344_v59  ;;  %v333_v17 = vadd.f32 1.0, %v3032_v60  ;;  %v369_v59 = vld [vmem:[#allocation2 + $0xa0] sm:$0xff] }
 0x112   :  { %v3036_v18 = vpop.eup %3035  ;;  %v347_v19 = vmul.f32 0.0, %v3034_v63  ;;  %3043 = vtanh.f32 %v3737_v61 }
 0x113   :  { %3045 = vrcp.f32 %v333_v17  ;;  %v332_v20 = vadd.f32 1.0, %v3036_v18 }
 0x114   :  { %v3038_v21 = vpop.eup %3037  ;;  %v3742_v22 = vadd.f32 %v351_v55, %v347_v19  ;;  %3047 = vtanh.f32 %v3739_v0  ;;  %v372_v19 = vld [vmem:[#allocation2 + $0xb8] sm:$0xff] }
 0x115   :  { %v3040_v23 = vpop.eup %3039  ;;  %v346_v24 = vmul.f32 0.0, %v3038_v21  ;;  %3049 = vrcp.f32 %v332_v20  ;;  %v371_v21 = vld [vmem:[#allocation2 + $0xb0] sm:$0xff] }
 0x116   :  { %v3042_v25 = vpop.eup %3041  ;;  %3051 = vtanh.f32 %v3742_v22  ;;  %v335_v26 = vadd.f32 1.0, %v3040_v23 }
 0x117   :  { %v3746_v27 = vadd.f32 %v350_v62, %v346_v24  ;;  %v334_v28 = vadd.f32 1.0, %v3042_v25 }
 0x118   :  { %3053 = vrcp.f32 %v335_v26 }
 0x119   :  { %3055 = vtanh.f32 %v3746_v27 }
 0x11a   :  { %3057 = vrcp.f32 %v334_v28 }
 0x11c   :  { %v3044_v29 = vpop.eup %3043 }
 0x11d   :  { %v3046_v30 = vpop.eup %3045 }
 0x11e   :  { %v3048_v31 = vpop.eup %3047  ;;  %v361_v32 = vmul.f32 %v3046_v30, %v3044_v29  ;;  %v374_v29 = vld [vmem:[#allocation2 + $0xc8] sm:$0xff] }
 0x11f   :  { %v3050_v33 = vpop.eup %3049 }
 0x120   :  { %v3052_v34 = vpop.eup %3051  ;;  %v360_v35 = vmul.f32 %v3050_v33, %v3048_v31 }
 0x122   :  { %v3054_v36 = vpop.eup %3053  ;;  %v2934_v37 = vpack.c.bf16 %v361_v32, %v360_v35 }
 0x123   :  { %v3056_v38 = vpop.eup %3055  ;;  %v363_v39 = vmul.f32 %v3054_v36, %v3052_v34 }
 0x124   :  { %v3058_v40 = vpop.eup %3057  ;;  %2935 = vmatprep.subr.bf16.mxu1 %v2934_v37 }
 0x125   :  { %2937 = vmatpush3.bf16.msra.mxu1 %v2934_v37  ;;  %v362_v41 = vmul.f32 %v3058_v40, %v3056_v38  ;;  %v373_v38 = vld [vmem:[#allocation2 + $0xc0] sm:$0xff]  ;;  %v376_v40 = vld [vmem:[#allocation2 + $0xd8] sm:$0xff] }
 0x127   :  { %v2938_v42 = vpack.c.bf16 %v363_v39, %v362_v41 }
 0x129   :  { %2939 = vmatprep.subr.bf16.mxu1 %v2938_v42 }
 0x12a   :  { %2941 = vmatpush3.bf16.msra.mxu1 %v2938_v42 }
 0x12d   :  { %2719 = vmatmul.mubr.msk.f32.vlgmr.msra.gmra.mrb[0].mxu1 %vm58_vm0, %v3629_v2 }
 0x12e   :  { %2721 = vmatprep.mubr.msk.f32.mxu1 %vm58_vm0, %v3634_v3 }
 0x131   :  { %2722 = vmatmul.mubr.msk.f32.gmra.mrb[2].mxu1 %vm58_vm0, %v3647_v4 }
 0x132   :  { %2724 = vmatprep.mubr.msk.f32.mxu1 %vm58_vm0, %v3652_v5 }
 0x135   :  { %2725 = vmatmul.mubr.msk.f32.gmra.mrb[4].mxu1 %vm58_vm0, %v3661_v6 }
 0x136   :  { %2727 = vmatprep.mubr.msk.f32.mxu1 %vm58_vm0, %v3666_v7 }
 0x139   :  { %2728 = vmatmul.mubr.msk.f32.gmra.mrb[6].mxu1 %vm58_vm0, %v3675_v8 }
 0x13a   :  { %2730 = vmatprep.mubr.msk.f32.mxu1 %vm58_vm0, %v3680_v9 }
 0x13d   :  { %2731 = vmatmul.mubr.msk.f32.gmra.mrb[8].mxu1 %vm58_vm0, %v3689_v10 }
 0x13e   :  { %2733 = vmatprep.mubr.msk.f32.mxu1 %vm58_vm0, %v3694_v11 }
 0x141   :  { %2734 = vmatmul.mubr.msk.f32.gmra.mrb[10].mxu1 %vm58_vm0, %v3703_v12 }
 0x142   :  { %2736 = vmatprep.mubr.msk.f32.mxu1 %vm58_vm0, %v3708_v13 }
 0x145   :  { %2737 = vmatmul.mubr.msk.f32.gmra.mrb[12].mxu1 %vm58_vm0, %v3717_v14 }
 0x146   :  { %2739 = vmatprep.mubr.msk.f32.mxu1 %vm58_vm0, %v3722_v15 }
 0x149   :  { %2740 = vmatmul.mubr.msk.f32.gmra.mrb[14].mxu1 %vm58_vm0, %v3731_v16 }
 0x14a   :  { %2782 = vmatprep.mubr.msk.f32.mxu1 %vm58_vm0, %v3624_v1 }
 0x200   :  { %v2720_v45 = vpop.f32.mrb[0].mxu1 }
 0x201   :  { %v527_v46 = vadd.f32 %v2720_v45, %v366_v43  ;;  %v447_v47 = vpop.f32.mrb[1].mxu1 }
 0x202   :  { %v526_v48 = vadd.f32 %v447_v47, %v365_v44 }
 0x203   :  { %v2348_v50 = vmul.f32 -1.442695, %v527_v46 }
 0x204   :  { %v2347_v52 = vmul.f32 -1.442695, %v526_v48  ;;  %v2723_v53 = vpop.f32.mrb[2].mxu1  ;;  %v375_v48 = vld [vmem:[#allocation2 + $0xd0] sm:$0xff] }
 0x205   :  { %3059 = vpow2.f32 %v2348_v50  ;;  %v529_v54 = vadd.f32 %v2723_v53, %v368_v49  ;;  %v457_v55 = vpop.f32.mrb[3].mxu1  ;;  %v378_v50 = vld [vmem:[#allocation2 + $0xe8] sm:$0xff] }
 0x206   :  { %3061 = vpow2.f32 %v2347_v52  ;;  %v528_v56 = vadd.f32 %v457_v55, %v367_v51  ;;  %v377_v52 = vld [vmem:[#allocation2 + $0xe0] sm:$0xff] }
 0x207   :  { %v2350_v58 = vmul.f32 -1.442695, %v529_v54 }
 0x208   :  { %v2349_v60 = vmul.f32 -1.442695, %v528_v56  ;;  %v2726_v62 = vpop.f32.mrb[4].mxu1 }
 0x209   :  { %3063 = vpow2.f32 %v2350_v58  ;;  %v531_v63 = vadd.f32 %v2726_v62, %v370_v57  ;;  %v467_v17 = vpop.f32.mrb[5].mxu1  ;;  %v380_v62 = vld [vmem:[#allocation2 + $0xf8] sm:$0xff] }
 0x20a   :  { %3065 = vpow2.f32 %v2349_v60  ;;  %v530_v18 = vadd.f32 %v467_v17, %v369_v59 }
 0x20b   :  { %v2352_v20 = vmul.f32 -1.442695, %v531_v63 }
 0x20c   :  { %v2351_v23 = vmul.f32 -1.442695, %v530_v18  ;;  %v2729_v24 = vpop.f32.mrb[6].mxu1  ;;  %v379_v18 = vld [vmem:[#allocation2 + $0xf0] sm:$0xff] }
 0x20d   :  { %3067 = vpow2.f32 %v2352_v20  ;;  %v533_v25 = vadd.f32 %v2729_v24, %v372_v19  ;;  %v477_v26 = vpop.f32.mrb[7].mxu1 }
 0x20e   :  { %3069 = vpow2.f32 %v2351_v23  ;;  %v532_v28 = vadd.f32 %v477_v26, %v371_v21 }
 0x20f   :  { %v3060_v30 = vpop.eup %3059  ;;  %v2354_v31 = vmul.f32 -1.442695, %v533_v25 }
 0x210   :  { %v3062_v32 = vpop.eup %3061  ;;  %v555_v33 = vadd.f32 1.0, %v3060_v30  ;;  %v2353_v34 = vmul.f32 -1.442695, %v532_v28  ;;  %v2732_v35 = vpop.f32.mrb[8].mxu1 }
 0x211   :  { %v554_v36 = vadd.f32 1.0, %v3062_v32  ;;  %3071 = vpow2.f32 %v2354_v31  ;;  %v535_v37 = vadd.f32 %v2732_v35, %v374_v29  ;;  %v487_v39 = vpop.f32.mrb[9].mxu1 }
 0x212   :  { %3073 = vrcp.f32 %v555_v33  ;;  %v534_v44 = vadd.f32 %v487_v39, %v373_v38 }
 0x213   :  { %v3064_v41 = vpop.eup %3063  ;;  %3075 = vrcp.f32 %v554_v36 }
 0x214   :  { %v3066_v42 = vpop.eup %3065  ;;  %v557_v43 = vadd.f32 1.0, %v3064_v41  ;;  %3077 = vpow2.f32 %v2353_v34  ;;  %v2735_v45 = vpop.f32.mrb[10].mxu1 }
 0x215   :  { %v556_v46 = vadd.f32 1.0, %v3066_v42  ;;  %3079 = vtanh.f32 %v535_v37  ;;  %v537_v47 = vadd.f32 %v2735_v45, %v376_v40  ;;  %v497_v49 = vpop.f32.mrb[11].mxu1 }
 0x216   :  { %3081 = vrcp.f32 %v557_v43  ;;  %v536_v55 = vadd.f32 %v497_v49, %v375_v48 }
 0x217   :  { %v3068_v51 = vpop.eup %3067  ;;  %3083 = vrcp.f32 %v556_v46 }
 0x218   :  { %v3070_v53 = vpop.eup %3069  ;;  %v579_v54 = vadd.f32 1.0, %v3068_v51  ;;  %3085 = vtanh.f32 %v534_v44  ;;  %v2738_v56 = vpop.f32.mrb[12].mxu1 }
 0x219   :  { %v578_v57 = vadd.f32 1.0, %v3070_v53  ;;  %3087 = vtanh.f32 %v537_v47  ;;  %v539_v58 = vadd.f32 %v2738_v56, %v378_v50  ;;  %v507_v59 = vpop.f32.mrb[13].mxu1 }
 0x21a   :  { %3089 = vrcp.f32 %v579_v54  ;;  %v538_v60 = vadd.f32 %v507_v59, %v377_v52 }
 0x21b   :  { %v3072_v63 = vpop.eup %3071  ;;  %3091 = vrcp.f32 %v578_v57  ;;  %v2356_v17 = vmul.f32 -1.442695, %v539_v58 }
 0x21c   :  { %v3074_v19 = vpop.eup %3073  ;;  %v581_v20 = vadd.f32 1.0, %v3072_v63  ;;  %3093 = vtanh.f32 %v536_v55  ;;  %v2355_v21 = vmul.f32 -1.442695, %v538_v60  ;;  %v2741_v23 = vpop.f32.mrb[14].mxu1 }
 0x21d   :  { %v3076_v24 = vpop.eup %3075  ;;  %3095 = vpow2.f32 %v2356_v17  ;;  %v541_v25 = vadd.f32 %v2741_v23, %v380_v62  ;;  %v517_v26 = vpop.f32.mrb[15].mxu1 }
 0x21e   :  { %v3078_v28 = vpop.eup %3077  ;;  %3097 = vrcp.f32 %v581_v20  ;;  %v540_v29 = vadd.f32 %v517_v26, %v379_v18 }
 0x21f   :  { %v3080_v30 = vpop.eup %3079  ;;  %v580_v31 = vadd.f32 1.0, %v3078_v28  ;;  %3099 = vpow2.f32 %v2355_v21  ;;  %v2358_v32 = vmul.f32 -1.442695, %v541_v25 }
 0x220   :  { %v3082_v33 = vpop.eup %3081  ;;  %v623_v34 = vmul.f32 %v3080_v30, %v3074_v19  ;;  %v2357_v35 = vmul.f32 -1.442695, %v540_v29  ;;  %v643_v30 = vld [vmem:[#allocation2 + $0x120] sm:$0xff] }
 0x221   :  { %v3084_v36 = vpop.eup %3083  ;;  %3101 = vrcp.f32 %v580_v31 }
 0x222   :  { %v3086_v37 = vpop.eup %3085  ;;  %3103 = vpow2.f32 %v2358_v32 }
 0x223   :  { %v3088_v38 = vpop.eup %3087  ;;  %v622_v39 = vmul.f32 %v3086_v37, %v3076_v24  ;;  %3105 = vpow2.f32 %v2357_v35  ;;  %v646_v35 = vld [vmem:[#allocation2 + $0x138] sm:$0xff]  ;;  %v645_v37 = vld [vmem:[#allocation2 + $0x130] sm:$0xff] }
 0x224   :  { %v3090_v40 = vpop.eup %3089  ;;  %v625_v41 = vmul.f32 %v3088_v38, %v3082_v33 }
 0x225   :  { %v3092_v42 = vpop.eup %3091  ;;  %v619_v43 = vmul.f32 %v3090_v40, %v3737_v61 }
 0x226   :  { %v3094_v44 = vpop.eup %3093  ;;  %v618_v45 = vmul.f32 %v3092_v42, %v3739_v0 }
 0x227   :  { %v3096_v46 = vpop.eup %3095  ;;  %v3783_v47 = vadd.f32 %v623_v34, %v619_v43  ;;  %v624_v48 = vmul.f32 %v3094_v44, %v3084_v36  ;;  %v648_v43 = vld [vmem:[#allocation2 + $0x148] sm:$0xff] }
 0x228   :  { %v3098_v49 = vpop.eup %3097  ;;  %v3785_v50 = vadd.f32 %v622_v39, %v618_v45  ;;  %v607_v51 = vadd.f32 1.0, %v3096_v46 }
 0x229   :  { %v3100_v52 = vpop.eup %3099  ;;  %v621_v53 = vmul.f32 %v3098_v49, %v3742_v22  ;;  %3107 = vtanh.f32 %v3783_v47 }
 0x22a   :  { %3109 = vtanh.f32 %v3785_v50  ;;  %v606_v54 = vadd.f32 1.0, %v3100_v52 }
 0x22b   :  { %v3102_v61 = vpop.eup %3101  ;;  %v3790_v55 = vadd.f32 %v625_v41, %v621_v53  ;;  %3111 = vrcp.f32 %v607_v51 }
 0x22c   :  { %v3104_v0 = vpop.eup %3103  ;;  %v620_v56 = vmul.f32 %v3102_v61, %v3746_v27  ;;  %3113 = vrcp.f32 %v606_v54  ;;  %v647_v54 = vld [vmem:[#allocation2 + $0x140] sm:$0xff] }
 0x22d   :  { %v3106_v57 = vpop.eup %3105  ;;  %3115 = vtanh.f32 %v3790_v55  ;;  %v609_v58 = vadd.f32 1.0, %v3104_v0  ;;  %v650_v0 = vld [vmem:[#allocation2 + $0x158] sm:$0xff] }
 0x22e   :  { %v3794_v59 = vadd.f32 %v624_v48, %v620_v56  ;;  %v608_v22 = vadd.f32 1.0, %v3106_v57 }
 0x22f   :  { %3117 = vrcp.f32 %v609_v58 }
 0x230   :  { %3119 = vtanh.f32 %v3794_v59 }
 0x231   :  { %3121 = vrcp.f32 %v608_v22 }
 0x233   :  { %v3108_v60 = vpop.eup %3107 }
 0x234   :  { %v3110_v62 = vpop.eup %3109 }
 0x235   :  { %v3112_v63 = vpop.eup %3111 }
 0x236   :  { %v3114_v17 = vpop.eup %3113  ;;  %v635_v18 = vmul.f32 %v3112_v63, %v3108_v60 }
 0x237   :  { %v3116_v19 = vpop.eup %3115  ;;  %v634_v20 = vmul.f32 %v3114_v17, %v3110_v62  ;;  %v649_v17 = vld [vmem:[#allocation2 + $0x150] sm:$0xff] }
 0x239   :  { %v3118_v27 = vpop.eup %3117  ;;  %v2942_v21 = vpack.c.bf16 %v635_v18, %v634_v20 }
 0x23a   :  { %v3120_v23 = vpop.eup %3119  ;;  %v637_v24 = vmul.f32 %v3118_v27, %v3116_v19  ;;  %v652_v19 = vld [vmem:[#allocation2 + $0x168] sm:$0xff]  ;;  %v651_v27 = vld [vmem:[#allocation2 + $0x160] sm:$0xff] }
 0x23b   :  { %v3122_v25 = vpop.eup %3121  ;;  %2943 = vmatprep.subr.bf16.mxu0 %v2942_v21 }
 0x23c   :  { %2945 = vmatpush3.bf16.msra.mxu0 %v2942_v21  ;;  %v636_v26 = vmul.f32 %v3122_v25, %v3120_v23 }
 0x23e   :  { %v2946_v28 = vpack.c.bf16 %v637_v24, %v636_v26 }
 0x240   :  { %2947 = vmatprep.subr.bf16.mxu0 %v2946_v28 }
 0x241   :  { %2949 = vmatpush3.bf16.msra.mxu0 %v2946_v28 }
 0x244   :  { %2751 = vmatmul.mubr.msk.f32.vlgmr.msra.gmra.mrb[16].mxu0 %vm58_vm0, %v3629_v2  ;;  %v640_v2 = vld [vmem:[#allocation2 + $0x108] sm:$0xff] }
 0x245   :  { %2753 = vmatprep.mubr.msk.f32.mxu0 %vm58_vm0, %v3634_v3  ;;  %v639_v3 = vld [vmem:[#allocation2 + $0x100] sm:$0xff] }
 0x248   :  { %2754 = vmatmul.mubr.msk.f32.gmra.mrb[18].mxu0 %vm58_vm0, %v3647_v4 }
 0x249   :  { %2756 = vmatprep.mubr.msk.f32.mxu0 %vm58_vm0, %v3652_v5 }
 0x24c   :  { %2757 = vmatmul.mubr.msk.f32.gmra.mrb[20].mxu0 %vm58_vm0, %v3661_v6 }
 0x24d   :  { %2759 = vmatprep.mubr.msk.f32.mxu0 %vm58_vm0, %v3666_v7 }
 0x250   :  { %2760 = vmatmul.mubr.msk.f32.gmra.mrb[22].mxu0 %vm58_vm0, %v3675_v8  ;;  %v642_v8 = vld [vmem:[#allocation2 + $0x118] sm:$0xff] }
 0x251   :  { %2762 = vmatprep.mubr.msk.f32.mxu0 %vm58_vm0, %v3680_v9 }
 0x254   :  { %2763 = vmatmul.mubr.msk.f32.gmra.mrb[24].mxu0 %vm58_vm0, %v3689_v10  ;;  %v641_v10 = vld [vmem:[#allocation2 + $0x110] sm:$0xff] }
 0x255   :  { %2765 = vmatprep.mubr.msk.f32.mxu0 %vm58_vm0, %v3694_v11 }
 0x258   :  { %2766 = vmatmul.mubr.msk.f32.gmra.mrb[26].mxu0 %vm58_vm0, %v3703_v12 }
 0x259   :  { %2768 = vmatprep.mubr.msk.f32.mxu0 %vm58_vm0, %v3708_v13 }
 0x25c   :  { %2769 = vmatmul.mubr.msk.f32.gmra.mrb[28].mxu0 %vm58_vm0, %v3717_v14 }
 0x25d   :  { %2771 = vmatprep.mubr.msk.f32.mxu0 %vm58_vm0, %v3722_v15 }
 0x260   :  { %2772 = vmatmul.mubr.msk.f32.gmra.mrb[30].mxu0 %vm58_vm0, %v3731_v16  ;;  %v644_v16 = vld [vmem:[#allocation2 + $0x128] sm:$0xff] }
 0x261   :  { %2814 = vmatprep.mubr.msk.f32.mxu0 %vm58_vm0, %v3624_v1 }
 0x317   :  { %v2752_v4 = vpop.f32.mrb[16].mxu0 }
 0x318   :  { %v801_v5 = vadd.f32 %v2752_v4, %v640_v2  ;;  %v721_v6 = vpop.f32.mrb[17].mxu0  ;;  %v654_v4 = vld [vmem:[#allocation2 + $0x178] sm:$0xff] }
 0x319   :  { %v800_v7 = vadd.f32 %v721_v6, %v639_v3 }
 0x31a   :  { %v2376_v9 = vmul.f32 -1.442695, %v801_v5 }
 0x31b   :  { %v2375_v11 = vmul.f32 -1.442695, %v800_v7  ;;  %v2755_v12 = vpop.f32.mrb[18].mxu0  ;;  %v653_v7 = vld [vmem:[#allocation2 + $0x170] sm:$0xff] }
 0x31c   :  { %3123 = vpow2.f32 %v2376_v9  ;;  %v803_v13 = vadd.f32 %v2755_v12, %v642_v8  ;;  %v731_v14 = vpop.f32.mrb[19].mxu0 }
 0x31d   :  { %3125 = vpow2.f32 %v2375_v11  ;;  %v802_v15 = vadd.f32 %v731_v14, %v641_v10 }
 0x31e   :  { %v2378_v29 = vmul.f32 -1.442695, %v803_v13 }
 0x31f   :  { %v2377_v1 = vmul.f32 -1.442695, %v802_v15  ;;  %v2758_v31 = vpop.f32.mrb[20].mxu0 }
 0x320   :  { %3127 = vpow2.f32 %v2378_v29  ;;  %v805_v32 = vadd.f32 %v2758_v31, %v644_v16  ;;  %v741_v33 = vpop.f32.mrb[21].mxu0 }
 0x321   :  { %3129 = vpow2.f32 %v2377_v1  ;;  %v804_v34 = vadd.f32 %v741_v33, %v643_v30 }
 0x322   :  { %v2380_v36 = vmul.f32 -1.442695, %v805_v32 }
 0x323   :  { %v2379_v38 = vmul.f32 -1.442695, %v804_v34  ;;  %v2761_v39 = vpop.f32.mrb[22].mxu0 }
 0x324   :  { %3131 = vpow2.f32 %v2380_v36  ;;  %v807_v40 = vadd.f32 %v2761_v39, %v646_v35  ;;  %v751_v41 = vpop.f32.mrb[23].mxu0 }
 0x325   :  { %3133 = vpow2.f32 %v2379_v38  ;;  %v806_v42 = vadd.f32 %v751_v41, %v645_v37 }
 0x326   :  { %v3124_v44 = vpop.eup %3123  ;;  %v2382_v45 = vmul.f32 -1.442695, %v807_v40 }
 0x327   :  { %v3126_v46 = vpop.eup %3125  ;;  %v829_v48 = vadd.f32 1.0, %v3124_v44  ;;  %v2381_v49 = vmul.f32 -1.442695, %v806_v42  ;;  %v2764_v51 = vpop.f32.mrb[24].mxu0 }
 0x328   :  { %v828_v52 = vadd.f32 1.0, %v3126_v46  ;;  %3135 = vpow2.f32 %v2382_v45  ;;  %v809_v53 = vadd.f32 %v2764_v51, %v648_v43  ;;  %v761_v61 = vpop.f32.mrb[25].mxu0 }
 0x329   :  { %3137 = vrcp.f32 %v829_v48  ;;  %v808_v22 = vadd.f32 %v761_v61, %v647_v54 }
 0x32a   :  { %v3128_v56 = vpop.eup %3127  ;;  %3139 = vrcp.f32 %v828_v52 }
 0x32b   :  { %v3130_v57 = vpop.eup %3129  ;;  %v831_v58 = vadd.f32 1.0, %v3128_v56  ;;  %3141 = vpow2.f32 %v2381_v49  ;;  %v2767_v60 = vpop.f32.mrb[26].mxu0 }
 0x32c   :  { %v830_v62 = vadd.f32 1.0, %v3130_v57  ;;  %3143 = vtanh.f32 %v809_v53  ;;  %v811_v63 = vadd.f32 %v2767_v60, %v650_v0  ;;  %v771_v18 = vpop.f32.mrb[27].mxu0 }
 0x32d   :  { %3145 = vrcp.f32 %v831_v58  ;;  %v810_v24 = vadd.f32 %v771_v18, %v649_v17 }
 0x32e   :  { %v3132_v20 = vpop.eup %3131  ;;  %3147 = vrcp.f32 %v830_v62 }
 0x32f   :  { %v3134_v21 = vpop.eup %3133  ;;  %v853_v23 = vadd.f32 1.0, %v3132_v20  ;;  %3149 = vtanh.f32 %v808_v22  ;;  %v2770_v25 = vpop.f32.mrb[28].mxu0 }
 0x330   :  { %v852_v26 = vadd.f32 1.0, %v3134_v21  ;;  %3151 = vtanh.f32 %v811_v63  ;;  %v813_v28 = vadd.f32 %v2770_v25, %v652_v19  ;;  %v781_v2 = vpop.f32.mrb[29].mxu0 }
 0x331   :  { %3153 = vrcp.f32 %v853_v23  ;;  %v812_v3 = vadd.f32 %v781_v2, %v651_v27  ;;  %v3862_v2 = vld [vmem:[%s4240_s1 + $0x18] sm:$0xff] }
 0x332   :  { %v3136_v5 = vpop.eup %3135  ;;  %3155 = vrcp.f32 %v852_v26  ;;  %v2384_v6 = vmul.f32 -1.442695, %v813_v28  ;;  %v3848_v26 = vld [vmem:[%s4240_s1 + $0x8] sm:$0xff]  ;;  %v3855_v28 = vld [vmem:[%s4240_s1 + $0x10] sm:$0xff] }
 0x333   :  { %v3138_v8 = vpop.eup %3137  ;;  %v855_v9 = vadd.f32 1.0, %v3136_v5  ;;  %3157 = vtanh.f32 %v810_v24  ;;  %v2383_v10 = vmul.f32 -1.442695, %v812_v3  ;;  %v2773_v11 = vpop.f32.mrb[30].mxu0  ;;  %v3869_v3 = vld [vmem:[%s4240_s1 + $0x20] sm:$0xff]  ;;  %v3883_v5 = vld [vmem:[%s4240_s1 + $0x30] sm:$0xff] }
 0x334   :  { %v3140_v12 = vpop.eup %3139  ;;  %3159 = vpow2.f32 %v2384_v6  ;;  %v815_v13 = vadd.f32 %v2773_v11, %v654_v4  ;;  %v791_v14 = vpop.f32.mrb[31].mxu0  ;;  %v3876_v4 = vld [vmem:[%s4240_s1 + $0x28] sm:$0xff]  ;;  %v3890_v6 = vld [vmem:[%s4240_s1 + $0x38] sm:$0xff]  ;;  %v3925_v11 = vld [vmem:[%s4240_s1 + $0x60] sm:$0xff] }
 0x335   :  { %v3142_v15 = vpop.eup %3141  ;;  %3161 = vrcp.f32 %v855_v9  ;;  %v814_v16 = vadd.f32 %v791_v14, %v653_v7  ;;  %v3897_v7 = vld [vmem:[%s4240_s1 + $0x40] sm:$0xff]  ;;  %v3911_v9 = vld [vmem:[%s4240_s1 + $0x50] sm:$0xff]  ;;  %v3946_v14 = vld [vmem:[%s4240_s1 + $0x78] sm:$0xff] }
 0x336   :  { %v3144_v29 = vpop.eup %3143  ;;  %v854_v30 = vadd.f32 1.0, %v3142_v15  ;;  %3163 = vpow2.f32 %v2383_v10  ;;  %v2386_v1 = vmul.f32 -1.442695, %v815_v13  ;;  %v3918_v10 = vld [vmem:[%s4240_s1 + $0x58] sm:$0xff]  ;;  %v3939_v13 = vld [vmem:[%s4240_s1 + $0x70] sm:$0xff]  ;;  %v3953_v15 = vld [vmem:[%s4240_s1] sm:$0xff] }
 0x337   :  { %v3146_v31 = vpop.eup %3145  ;;  %v897_v32 = vmul.f32 %v3144_v29, %v3138_v8  ;;  %v2385_v33 = vmul.f32 -1.442695, %v814_v16  ;;  %v3904_v8 = vld [vmem:[%s4240_s1 + $0x48] sm:$0xff]  ;;  %v913_v29 = vld [vmem:[#allocation2 + $0x180] sm:$0xff] }
 0x338   :  { %v3148_v34 = vpop.eup %3147  ;;  %3165 = vrcp.f32 %v854_v30  ;;  %v914_v16 = vld [vmem:[#allocation2 + $0x188] sm:$0xff] }
 0x339   :  { %v3150_v35 = vpop.eup %3149  ;;  %3167 = vpow2.f32 %v2386_v1 }
 0x33a   :  { %v3152_v36 = vpop.eup %3151  ;;  %v896_v37 = vmul.f32 %v3150_v35, %v3140_v12  ;;  %3169 = vpow2.f32 %v2385_v33  ;;  %v3932_v12 = vld [vmem:[%s4240_s1 + $0x68] sm:$0xff]  ;;  %v916_v33 = vld [vmem:[#allocation2 + $0x198] sm:$0xff]  ;;  %v915_v35 = vld [vmem:[#allocation2 + $0x190] sm:$0xff] }
 0x33b   :  { %v3154_v38 = vpop.eup %3153  ;;  %v899_v39 = vmul.f32 %v3152_v36, %v3146_v31 }
 0x33c   :  { %v3156_v40 = vpop.eup %3155  ;;  %v893_v41 = vmul.f32 %v3154_v38, %v3783_v47 }
 0x33d   :  { %v3158_v42 = vpop.eup %3157  ;;  %v892_v43 = vmul.f32 %v3156_v40, %v3785_v50 }
 0x33e   :  { %v3160_v44 = vpop.eup %3159  ;;  %v3831_v45 = vadd.f32 %v897_v32, %v893_v41  ;;  %v898_v46 = vmul.f32 %v3158_v42, %v3148_v34  ;;  %v918_v41 = vld [vmem:[#allocation2 + $0x1a8] sm:$0xff] }
 0x33f   :  { %v3162_v48 = vpop.eup %3161  ;;  %v3833_v49 = vadd.f32 %v896_v37, %v892_v43  ;;  %v881_v51 = vadd.f32 1.0, %v3160_v44  ;;  %v917_v43 = vld [vmem:[#allocation2 + $0x1a0] sm:$0xff] }
 0x340   :  { %v3164_v52 = vpop.eup %3163  ;;  %v895_v53 = vmul.f32 %v3162_v48, %v3790_v55  ;;  %3171 = vtanh.f32 %v3831_v45 }
 0x341   :  { %3173 = vtanh.f32 %v3833_v49  ;;  %v880_v54 = vadd.f32 1.0, %v3164_v52 }
 0x342   :  { %v3166_v47 = vpop.eup %3165  ;;  %v3838_v61 = vadd.f32 %v899_v39, %v895_v53  ;;  %3175 = vrcp.f32 %v881_v51  ;;  %v920_v53 = vld [vmem:[#allocation2 + $0x1b8] sm:$0xff] }
 0x343   :  { %v3168_v50 = vpop.eup %3167  ;;  %v894_v0 = vmul.f32 %v3166_v47, %v3794_v59  ;;  %3177 = vrcp.f32 %v880_v54  ;;  %v919_v47 = vld [vmem:[#allocation2 + $0x1b0] sm:$0xff] }
 0x344   :  { %v3170_v56 = vpop.eup %3169  ;;  %3179 = vtanh.f32 %v3838_v61  ;;  %v883_v57 = vadd.f32 1.0, %v3168_v50 }
 0x345   :  { %v3842_v58 = vadd.f32 %v898_v46, %v894_v0  ;;  %v882_v55 = vadd.f32 1.0, %v3170_v56 }
 0x346   :  { %3181 = vrcp.f32 %v883_v57 }
 0x347   :  { %3183 = vtanh.f32 %v3842_v58 }
 0x348   :  { %3185 = vrcp.f32 %v882_v55 }
 0x34a   :  { %v3172_v22 = vpop.eup %3171 }
 0x34b   :  { %v3174_v60 = vpop.eup %3173 }
 0x34c   :  { %v3176_v62 = vpop.eup %3175 }
 0x34d   :  { %v3178_v63 = vpop.eup %3177  ;;  %v909_v17 = vmul.f32 %v3176_v62, %v3172_v22  ;;  %v922_v22 = vld [vmem:[#allocation2 + $0x1c8] sm:$0xff] }
 0x34e   :  { %v3180_v18 = vpop.eup %3179  ;;  %v908_v19 = vmul.f32 %v3178_v63, %v3174_v60 }
 0x350   :  { %v3182_v59 = vpop.eup %3181  ;;  %v2950_v20 = vpack.c.bf16 %v909_v17, %v908_v19 }
 0x351   :  { %v3184_v27 = vpop.eup %3183  ;;  %v911_v21 = vmul.f32 %v3182_v59, %v3180_v18 }
 0x352   :  { %v3186_v23 = vpop.eup %3185  ;;  %2951 = vmatprep.subr.bf16.mxu1 %v2950_v20 }
 0x353   :  { %2953 = vmatpush3.bf16.msra.mxu1 %v2950_v20  ;;  %v910_v24 = vmul.f32 %v3186_v23, %v3184_v27  ;;  %v921_v27 = vld [vmem:[#allocation2 + $0x1c0] sm:$0xff]  ;;  %v924_v23 = vld [vmem:[#allocation2 + $0x1d8] sm:$0xff] }
 0x355   :  { %v2954_v25 = vpack.c.bf16 %v911_v21, %v910_v24 }
 0x357   :  { %2955 = vmatprep.subr.bf16.mxu1 %v2954_v25 }
 0x358   :  { %2957 = vmatpush3.bf16.msra.mxu1 %v2954_v25 }
 0x35b   :  { %2783 = vmatmul.mubr.msk.f32.vlgmr.msra.gmra.mrb[16].mxu1 %vm58_vm0, %v3848_v26 }
 0x35c   :  { %2785 = vmatprep.mubr.msk.f32.mxu1 %vm58_vm0, %v3855_v28 }
 0x35f   :  { %2786 = vmatmul.mubr.msk.f32.gmra.mrb[18].mxu1 %vm58_vm0, %v3862_v2 }
 0x360   :  { %2788 = vmatprep.mubr.msk.f32.mxu1 %vm58_vm0, %v3869_v3 }
 0x363   :  { %2789 = vmatmul.mubr.msk.f32.gmra.mrb[20].mxu1 %vm58_vm0, %v3876_v4 }
 0x364   :  { %2791 = vmatprep.mubr.msk.f32.mxu1 %vm58_vm0, %v3883_v5 }
 0x367   :  { %2792 = vmatmul.mubr.msk.f32.gmra.mrb[22].mxu1 %vm58_vm0, %v3890_v6 }
 0x368   :  { %2794 = vmatprep.mubr.msk.f32.mxu1 %vm58_vm0, %v3897_v7 }
 0x36b   :  { %2795 = vmatmul.mubr.msk.f32.gmra.mrb[24].mxu1 %vm58_vm0, %v3904_v8 }
 0x36c   :  { %2797 = vmatprep.mubr.msk.f32.mxu1 %vm58_vm0, %v3911_v9 }
 0x36f   :  { %2798 = vmatmul.mubr.msk.f32.gmra.mrb[26].mxu1 %vm58_vm0, %v3918_v10 }
 0x370   :  { %2800 = vmatprep.mubr.msk.f32.mxu1 %vm58_vm0, %v3925_v11 }
 0x373   :  { %2801 = vmatmul.mubr.msk.f32.gmra.mrb[28].mxu1 %vm58_vm0, %v3932_v12 }
 0x374   :  { %2803 = vmatprep.mubr.msk.f32.mxu1 %vm58_vm0, %v3939_v13 }
 0x377   :  { %2804 = vmatmul.mubr.msk.f32.gmra.mrb[30].mxu1 %vm58_vm0, %v3946_v14 }
 0x378   :  { %2846 = vmatprep.mubr.msk.f32.mxu1 %vm58_vm0, %v3953_v15 }
 0x42e   :  { %v2784_v30 = vpop.f32.mrb[16].mxu1 }
 0x42f   :  { %v1075_v1 = vadd.f32 %v2784_v30, %v914_v16  ;;  %v995_v31 = vpop.f32.mrb[17].mxu1 }
 0x430   :  { %v1074_v32 = vadd.f32 %v995_v31, %v913_v29 }
 0x431   :  { %v2404_v34 = vmul.f32 -1.442695, %v1075_v1 }
 0x432   :  { %v2403_v36 = vmul.f32 -1.442695, %v1074_v32  ;;  %v2787_v37 = vpop.f32.mrb[18].mxu1  ;;  %v923_v32 = vld [vmem:[#allocation2 + $0x1d0] sm:$0xff] }
 0x433   :  { %3187 = vpow2.f32 %v2404_v34  ;;  %v1077_v38 = vadd.f32 %v2787_v37, %v916_v33  ;;  %v1005_v39 = vpop.f32.mrb[19].mxu1  ;;  %v926_v34 = vld [vmem:[#allocation2 + $0x1e8] sm:$0xff] }
 0x434   :  { %3189 = vpow2.f32 %v2403_v36  ;;  %v1076_v40 = vadd.f32 %v1005_v39, %v915_v35  ;;  %v925_v36 = vld [vmem:[#allocation2 + $0x1e0] sm:$0xff] }
 0x435   :  { %v2406_v42 = vmul.f32 -1.442695, %v1077_v38 }
 0x436   :  { %v2405_v44 = vmul.f32 -1.442695, %v1076_v40  ;;  %v2790_v46 = vpop.f32.mrb[20].mxu1 }
 0x437   :  { %3191 = vpow2.f32 %v2406_v42  ;;  %v1079_v48 = vadd.f32 %v2790_v46, %v918_v41  ;;  %v1015_v51 = vpop.f32.mrb[21].mxu1  ;;  %v928_v46 = vld [vmem:[#allocation2 + $0x1f8] sm:$0xff] }
 0x438   :  { %3193 = vpow2.f32 %v2405_v44  ;;  %v1078_v52 = vadd.f32 %v1015_v51, %v917_v43 }
 0x439   :  { %v2408_v54 = vmul.f32 -1.442695, %v1079_v48 }
 0x43a   :  { %v2407_v50 = vmul.f32 -1.442695, %v1078_v52  ;;  %v2793_v0 = vpop.f32.mrb[22].mxu1  ;;  %v927_v52 = vld [vmem:[#allocation2 + $0x1f0] sm:$0xff] }
 0x43b   :  { %3195 = vpow2.f32 %v2408_v54  ;;  %v1081_v56 = vadd.f32 %v2793_v0, %v920_v53  ;;  %v1025_v57 = vpop.f32.mrb[23].mxu1 }
 0x43c   :  { %3197 = vpow2.f32 %v2407_v50  ;;  %v1080_v55 = vadd.f32 %v1025_v57, %v919_v47 }
 0x43d   :  { %v3188_v60 = vpop.eup %3187  ;;  %v2410_v62 = vmul.f32 -1.442695, %v1081_v56 }
 0x43e   :  { %v3190_v63 = vpop.eup %3189  ;;  %v1103_v17 = vadd.f32 1.0, %v3188_v60  ;;  %v2409_v18 = vmul.f32 -1.442695, %v1080_v55  ;;  %v2796_v19 = vpop.f32.mrb[24].mxu1 }
 0x43f   :  { %v1102_v59 = vadd.f32 1.0, %v3190_v63  ;;  %3199 = vpow2.f32 %v2410_v62  ;;  %v1083_v20 = vadd.f32 %v2796_v19, %v922_v22  ;;  %v1035_v21 = vpop.f32.mrb[25].mxu1 }
 0x440   :  { %3201 = vrcp.f32 %v1103_v17  ;;  %v1082_v29 = vadd.f32 %v1035_v21, %v921_v27 }
 0x441   :  { %v3192_v24 = vpop.eup %3191  ;;  %3203 = vrcp.f32 %v1102_v59 }
 0x442   :  { %v3194_v25 = vpop.eup %3193  ;;  %v1105_v16 = vadd.f32 1.0, %v3192_v24  ;;  %3205 = vpow2.f32 %v2409_v18  ;;  %v2799_v30 = vpop.f32.mrb[26].mxu1 }
 0x443   :  { %v1104_v1 = vadd.f32 1.0, %v3194_v25  ;;  %3207 = vtanh.f32 %v1083_v20  ;;  %v1085_v31 = vadd.f32 %v2799_v30, %v924_v23  ;;  %v1045_v33 = vpop.f32.mrb[27].mxu1 }
 0x444   :  { %3209 = vrcp.f32 %v1105_v16  ;;  %v1084_v39 = vadd.f32 %v1045_v33, %v923_v32 }
 0x445   :  { %v3196_v35 = vpop.eup %3195  ;;  %3211 = vrcp.f32 %v1104_v1 }
 0x446   :  { %v3198_v37 = vpop.eup %3197  ;;  %v1127_v38 = vadd.f32 1.0, %v3196_v35  ;;  %3213 = vtanh.f32 %v1082_v29  ;;  %v2802_v40 = vpop.f32.mrb[28].mxu1 }
 0x447   :  { %v1126_v41 = vadd.f32 1.0, %v3198_v37  ;;  %3215 = vtanh.f32 %v1085_v31  ;;  %v1087_v42 = vadd.f32 %v2802_v40, %v926_v34  ;;  %v1055_v43 = vpop.f32.mrb[29].mxu1 }
 0x448   :  { %3217 = vrcp.f32 %v1127_v38  ;;  %v1086_v44 = vadd.f32 %v1055_v43, %v925_v36 }
 0x449   :  { %v3200_v48 = vpop.eup %3199  ;;  %3219 = vrcp.f32 %v1126_v41  ;;  %v2412_v51 = vmul.f32 -1.442695, %v1087_v42 }
 0x44a   :  { %v3202_v53 = vpop.eup %3201  ;;  %v1129_v54 = vadd.f32 1.0, %v3200_v48  ;;  %3221 = vtanh.f32 %v1084_v39  ;;  %v2411_v47 = vmul.f32 -1.442695, %v1086_v44  ;;  %v2805_v50 = vpop.f32.mrb[30].mxu1 }
 0x44b   :  { %v3204_v0 = vpop.eup %3203  ;;  %3223 = vpow2.f32 %v2412_v51  ;;  %v1089_v56 = vadd.f32 %v2805_v50, %v928_v46  ;;  %v1065_v57 = vpop.f32.mrb[31].mxu1 }
 0x44c   :  { %v3206_v55 = vpop.eup %3205  ;;  %3225 = vrcp.f32 %v1129_v54  ;;  %v1088_v22 = vadd.f32 %v1065_v57, %v927_v52 }
 0x44d   :  { %v3208_v60 = vpop.eup %3207  ;;  %v1128_v62 = vadd.f32 1.0, %v3206_v55  ;;  %3227 = vpow2.f32 %v2411_v47  ;;  %v2414_v63 = vmul.f32 -1.442695, %v1089_v56 }
 0x44e   :  { %v3210_v17 = vpop.eup %3209  ;;  %v1171_v18 = vmul.f32 %v3208_v60, %v3202_v53  ;;  %v2413_v19 = vmul.f32 -1.442695, %v1088_v22  ;;  %v1188_v22 = vld [vmem:[#allocation2 + $0x208] sm:$0xff]  ;;  %v1187_v60 = vld [vmem:[#allocation2 + $0x200] sm:$0xff] }
 0x44f   :  { %v3212_v59 = vpop.eup %3211  ;;  %3229 = vrcp.f32 %v1128_v62 }
 0x450   :  { %v3214_v20 = vpop.eup %3213  ;;  %3231 = vpow2.f32 %v2414_v63 }
 0x451   :  { %v3216_v27 = vpop.eup %3215  ;;  %v1170_v21 = vmul.f32 %v3214_v20, %v3204_v0  ;;  %3233 = vpow2.f32 %v2413_v19  ;;  %v1190_v19 = vld [vmem:[#allocation2 + $0x218] sm:$0xff]  ;;  %v1189_v20 = vld [vmem:[#allocation2 + $0x210] sm:$0xff] }
 0x452   :  { %v3218_v23 = vpop.eup %3217  ;;  %v1173_v24 = vmul.f32 %v3216_v27, %v3210_v17 }
 0x453   :  { %v3220_v25 = vpop.eup %3219  ;;  %v1167_v16 = vmul.f32 %v3218_v23, %v3831_v45 }
 0x454   :  { %v3222_v29 = vpop.eup %3221  ;;  %v1166_v30 = vmul.f32 %v3220_v25, %v3833_v49 }
 0x455   :  { %v3224_v1 = vpop.eup %3223  ;;  %v3959_v31 = vadd.f32 %v1171_v18, %v1167_v16  ;;  %v1172_v32 = vmul.f32 %v3222_v29, %v3212_v59  ;;  %v1192_v16 = vld [vmem:[#allocation2 + $0x228] sm:$0xff] }
 0x456   :  { %v3226_v33 = vpop.eup %3225  ;;  %v3961_v34 = vadd.f32 %v1170_v21, %v1166_v30  ;;  %v1155_v35 = vadd.f32 1.0, %v3224_v1  ;;  %v1191_v30 = vld [vmem:[#allocation2 + $0x220] sm:$0xff] }
 0x457   :  { %v3228_v36 = vpop.eup %3227  ;;  %v1169_v37 = vmul.f32 %v3226_v33, %v3838_v61  ;;  %3235 = vtanh.f32 %v3959_v31 }
 0x458   :  { %3237 = vtanh.f32 %v3961_v34  ;;  %v1154_v38 = vadd.f32 1.0, %v3228_v36 }
 0x459   :  { %v3230_v45 = vpop.eup %3229  ;;  %v3966_v39 = vadd.f32 %v1173_v24, %v1169_v37  ;;  %3239 = vrcp.f32 %v1155_v35  ;;  %v1194_v37 = vld [vmem:[#allocation2 + $0x238] sm:$0xff] }
 0x45a   :  { %v3232_v49 = vpop.eup %3231  ;;  %v1168_v40 = vmul.f32 %v3230_v45, %v3842_v58  ;;  %3241 = vrcp.f32 %v1154_v38  ;;  %v1193_v45 = vld [vmem:[#allocation2 + $0x230] sm:$0xff] }
 0x45b   :  { %v3234_v41 = vpop.eup %3233  ;;  %3243 = vtanh.f32 %v3966_v39  ;;  %v1157_v42 = vadd.f32 1.0, %v3232_v49 }
 0x45c   :  { %v3970_v43 = vadd.f32 %v1172_v32, %v1168_v40  ;;  %v1156_v61 = vadd.f32 1.0, %v3234_v41 }
 0x45d   :  { %3245 = vrcp.f32 %v1157_v42 }
 0x45e   :  { %3247 = vtanh.f32 %v3970_v43 }
 0x45f   :  { %3249 = vrcp.f32 %v1156_v61 }
 0x461   :  { %v3236_v44 = vpop.eup %3235 }
 0x462   :  { %v3238_v46 = vpop.eup %3237 }
 0x463   :  { %v3240_v48 = vpop.eup %3239 }
 0x464   :  { %v3242_v51 = vpop.eup %3241  ;;  %v1183_v52 = vmul.f32 %v3240_v48, %v3236_v44  ;;  %v1196_v44 = vld [vmem:[#allocation2 + $0x248] sm:$0xff] }
 0x465   :  { %v3244_v53 = vpop.eup %3243  ;;  %v1182_v54 = vmul.f32 %v3242_v51, %v3238_v46 }
 0x467   :  { %v3246_v58 = vpop.eup %3245  ;;  %v2958_v47 = vpack.c.bf16 %v1183_v52, %v1182_v54 }
 0x468   :  { %v3248_v50 = vpop.eup %3247  ;;  %v1185_v0 = vmul.f32 %v3246_v58, %v3244_v53 }
 0x469   :  { %v3250_v56 = vpop.eup %3249  ;;  %2959 = vmatprep.subr.bf16.mxu0 %v2958_v47 }
 0x46a   :  { %2961 = vmatpush3.bf16.msra.mxu0 %v2958_v47  ;;  %v1184_v57 = vmul.f32 %v3250_v56, %v3248_v50  ;;  %v1195_v50 = vld [vmem:[#allocation2 + $0x240] sm:$0xff]  ;;  %v1198_v56 = vld [vmem:[#allocation2 + $0x258] sm:$0xff] }
 0x46c   :  { %v2962_v55 = vpack.c.bf16 %v1185_v0, %v1184_v57 }
 0x46e   :  { %2963 = vmatprep.subr.bf16.mxu0 %v2962_v55 }
 0x46f   :  { %2965 = vmatpush3.bf16.msra.mxu0 %v2962_v55 }
 0x472   :  { %2815 = vmatmul.mubr.msk.f32.vlgmr.msra.gmra.mrb[32].mxu0 %vm58_vm0, %v3848_v26 }
 0x473   :  { %2817 = vmatprep.mubr.msk.f32.mxu0 %vm58_vm0, %v3855_v28 }
 0x476   :  { %2818 = vmatmul.mubr.msk.f32.gmra.mrb[34].mxu0 %vm58_vm0, %v3862_v2 }
 0x477   :  { %2820 = vmatprep.mubr.msk.f32.mxu0 %vm58_vm0, %v3869_v3 }
 0x47a   :  { %2821 = vmatmul.mubr.msk.f32.gmra.mrb[36].mxu0 %vm58_vm0, %v3876_v4 }
 0x47b   :  { %2823 = vmatprep.mubr.msk.f32.mxu0 %vm58_vm0, %v3883_v5 }
 0x47e   :  { %2824 = vmatmul.mubr.msk.f32.gmra.mrb[38].mxu0 %vm58_vm0, %v3890_v6 }
 0x47f   :  { %2826 = vmatprep.mubr.msk.f32.mxu0 %vm58_vm0, %v3897_v7 }
 0x482   :  { %2827 = vmatmul.mubr.msk.f32.gmra.mrb[40].mxu0 %vm58_vm0, %v3904_v8 }
 0x483   :  { %2829 = vmatprep.mubr.msk.f32.mxu0 %vm58_vm0, %v3911_v9 }
 0x486   :  { %2830 = vmatmul.mubr.msk.f32.gmra.mrb[42].mxu0 %vm58_vm0, %v3918_v10 }
 0x487   :  { %2832 = vmatprep.mubr.msk.f32.mxu0 %vm58_vm0, %v3925_v11 }
 0x48a   :  { %2833 = vmatmul.mubr.msk.f32.gmra.mrb[44].mxu0 %vm58_vm0, %v3932_v12 }
 0x48b   :  { %2835 = vmatprep.mubr.msk.f32.mxu0 %vm58_vm0, %v3939_v13 }
 0x48e   :  { %2836 = vmatmul.mubr.msk.f32.gmra.mrb[46].mxu0 %vm58_vm0, %v3946_v14 }
 0x48f   :  { %2878 = vmatprep.mubr.msk.f32.mxu0 %vm58_vm0, %v3953_v15 }
 0x545   :  { %v2816_v62 = vpop.f32.mrb[32].mxu0 }
 0x546   :  { %v1349_v63 = vadd.f32 %v2816_v62, %v1188_v22  ;;  %v1269_v17 = vpop.f32.mrb[33].mxu0 }
 0x547   :  { %v1348_v18 = vadd.f32 %v1269_v17, %v1187_v60 }
 0x548   :  { %v2432_v59 = vmul.f32 -1.442695, %v1349_v63 }
 0x549   :  { %v2431_v27 = vmul.f32 -1.442695, %v1348_v18  ;;  %v2819_v21 = vpop.f32.mrb[34].mxu0  ;;  %v1197_v18 = vld [vmem:[#allocation2 + $0x250] sm:$0xff] }
 0x54a   :  { %3251 = vpow2.f32 %v2432_v59  ;;  %v1351_v23 = vadd.f32 %v2819_v21, %v1190_v19  ;;  %v1279_v24 = vpop.f32.mrb[35].mxu0  ;;  %v1200_v59 = vld [vmem:[#allocation2 + $0x268] sm:$0xff] }
 0x54b   :  { %3253 = vpow2.f32 %v2431_v27  ;;  %v1350_v25 = vadd.f32 %v1279_v24, %v1189_v20  ;;  %v1199_v27 = vld [vmem:[#allocation2 + $0x260] sm:$0xff] }
 0x54c   :  { %v2434_v29 = vmul.f32 -1.442695, %v1351_v23 }
 0x54d   :  { %v2433_v1 = vmul.f32 -1.442695, %v1350_v25  ;;  %v2822_v32 = vpop.f32.mrb[36].mxu0 }
 0x54e   :  { %3255 = vpow2.f32 %v2434_v29  ;;  %v1353_v33 = vadd.f32 %v2822_v32, %v1192_v16  ;;  %v1289_v35 = vpop.f32.mrb[37].mxu0  ;;  %v1202_v32 = vld [vmem:[#allocation2 + $0x278] sm:$0xff] }
 0x54f   :  { %3257 = vpow2.f32 %v2433_v1  ;;  %v1352_v36 = vadd.f32 %v1289_v35, %v1191_v30 }
 0x550   :  { %v2436_v38 = vmul.f32 -1.442695, %v1353_v33 }
 0x551   :  { %v2435_v49 = vmul.f32 -1.442695, %v1352_v36  ;;  %v2825_v40 = vpop.f32.mrb[38].mxu0  ;;  %v1201_v36 = vld [vmem:[#allocation2 + $0x270] sm:$0xff] }
 0x552   :  { %3259 = vpow2.f32 %v2436_v38  ;;  %v1355_v41 = vadd.f32 %v2825_v40, %v1194_v37  ;;  %v1299_v42 = vpop.f32.mrb[39].mxu0 }
 0x553   :  { %3261 = vpow2.f32 %v2435_v49  ;;  %v1354_v61 = vadd.f32 %v1299_v42, %v1193_v45 }
 0x554   :  { %v3252_v46 = vpop.eup %3251  ;;  %v2438_v48 = vmul.f32 -1.442695, %v1355_v41 }
 0x555   :  { %v3254_v51 = vpop.eup %3253  ;;  %v1377_v52 = vadd.f32 1.0, %v3252_v46  ;;  %v2437_v53 = vmul.f32 -1.442695, %v1354_v61  ;;  %v2828_v54 = vpop.f32.mrb[40].mxu0 }
 0x556   :  { %v1376_v58 = vadd.f32 1.0, %v3254_v51  ;;  %3263 = vpow2.f32 %v2438_v48  ;;  %v1357_v47 = vadd.f32 %v2828_v54, %v1196_v44  ;;  %v1309_v0 = vpop.f32.mrb[41].mxu0 }
 0x557   :  { %3265 = vrcp.f32 %v1377_v52  ;;  %v1356_v60 = vadd.f32 %v1309_v0, %v1195_v50 }
 0x558   :  { %v3256_v57 = vpop.eup %3255  ;;  %3267 = vrcp.f32 %v1376_v58 }
 0x559   :  { %v3258_v55 = vpop.eup %3257  ;;  %v1379_v22 = vadd.f32 1.0, %v3256_v57  ;;  %3269 = vpow2.f32 %v2437_v53  ;;  %v2831_v62 = vpop.f32.mrb[42].mxu0 }
 0x55a   :  { %v1378_v63 = vadd.f32 1.0, %v3258_v55  ;;  %3271 = vtanh.f32 %v1357_v47  ;;  %v1359_v17 = vadd.f32 %v2831_v62, %v1198_v56  ;;  %v1319_v19 = vpop.f32.mrb[43].mxu0 }
 0x55b   :  { %3273 = vrcp.f32 %v1379_v22  ;;  %v1358_v24 = vadd.f32 %v1319_v19, %v1197_v18 }
 0x55c   :  { %v3260_v20 = vpop.eup %3259  ;;  %3275 = vrcp.f32 %v1378_v63 }
 0x55d   :  { %v3262_v21 = vpop.eup %3261  ;;  %v1401_v23 = vadd.f32 1.0, %v3260_v20  ;;  %3277 = vtanh.f32 %v1356_v60  ;;  %v2834_v25 = vpop.f32.mrb[44].mxu0 }
 0x55e   :  { %v1400_v16 = vadd.f32 1.0, %v3262_v21  ;;  %3279 = vtanh.f32 %v1359_v17  ;;  %v1361_v29 = vadd.f32 %v2834_v25, %v1200_v59  ;;  %v1329_v30 = vpop.f32.mrb[45].mxu0 }
 0x55f   :  { %3281 = vrcp.f32 %v1401_v23  ;;  %v1360_v1 = vadd.f32 %v1329_v30, %v1199_v27 }
 0x560   :  { %v3264_v33 = vpop.eup %3263  ;;  %3283 = vrcp.f32 %v1400_v16  ;;  %v2440_v35 = vmul.f32 -1.442695, %v1361_v29 }
 0x561   :  { %v3266_v37 = vpop.eup %3265  ;;  %v1403_v38 = vadd.f32 1.0, %v3264_v33  ;;  %3285 = vtanh.f32 %v1358_v24  ;;  %v2439_v45 = vmul.f32 -1.442695, %v1360_v1  ;;  %v2837_v49 = vpop.f32.mrb[46].mxu0 }
 0x562   :  { %v3268_v40 = vpop.eup %3267  ;;  %3287 = vpow2.f32 %v2440_v35  ;;  %v1363_v41 = vadd.f32 %v2837_v49, %v1202_v32  ;;  %v1339_v42 = vpop.f32.mrb[47].mxu0 }
 0x563   :  { %v3270_v61 = vpop.eup %3269  ;;  %3289 = vrcp.f32 %v1403_v38  ;;  %v1362_v44 = vadd.f32 %v1339_v42, %v1201_v36 }
 0x564   :  { %v3272_v46 = vpop.eup %3271  ;;  %v1402_v48 = vadd.f32 1.0, %v3270_v61  ;;  %3291 = vpow2.f32 %v2439_v45  ;;  %v2442_v51 = vmul.f32 -1.442695, %v1363_v41 }
 0x565   :  { %v3274_v52 = vpop.eup %3273  ;;  %v1445_v53 = vmul.f32 %v3272_v46, %v3266_v37  ;;  %v2441_v54 = vmul.f32 -1.442695, %v1362_v44  ;;  %v1465_v46 = vld [vmem:[#allocation2 + $0x2a0] sm:$0xff] }
 0x566   :  { %v3276_v58 = vpop.eup %3275  ;;  %3293 = vrcp.f32 %v1402_v48 }
 0x567   :  { %v3278_v47 = vpop.eup %3277  ;;  %3295 = vpow2.f32 %v2442_v51 }
 0x568   :  { %v3280_v50 = vpop.eup %3279  ;;  %v1444_v0 = vmul.f32 %v3278_v47, %v3268_v40  ;;  %3297 = vpow2.f32 %v2441_v54  ;;  %v1468_v54 = vld [vmem:[#allocation2 + $0x2b8] sm:$0xff]  ;;  %v1467_v47 = vld [vmem:[#allocation2 + $0x2b0] sm:$0xff] }
 0x569   :  { %v3282_v56 = vpop.eup %3281  ;;  %v1447_v57 = vmul.f32 %v3280_v50, %v3274_v52 }
 0x56a   :  { %v3284_v55 = vpop.eup %3283  ;;  %v1441_v22 = vmul.f32 %v3282_v56, %v3959_v31 }
 0x56b   :  { %v3286_v60 = vpop.eup %3285  ;;  %v1440_v62 = vmul.f32 %v3284_v55, %v3961_v34 }
 0x56c   :  { %v3288_v63 = vpop.eup %3287  ;;  %v4007_v17 = vadd.f32 %v1445_v53, %v1441_v22  ;;  %v1446_v18 = vmul.f32 %v3286_v60, %v3276_v58  ;;  %v1470_v22 = vld [vmem:[#allocation2 + $0x2c8] sm:$0xff] }
 0x56d   :  { %v3290_v19 = vpop.eup %3289  ;;  %v4009_v59 = vadd.f32 %v1444_v0, %v1440_v62  ;;  %v1429_v20 = vadd.f32 1.0, %v3288_v63 }
 0x56e   :  { %v3292_v27 = vpop.eup %3291  ;;  %v1443_v21 = vmul.f32 %v3290_v19, %v3966_v39  ;;  %3299 = vtanh.f32 %v4007_v17 }
 0x56f   :  { %3301 = vtanh.f32 %v4009_v59  ;;  %v1428_v23 = vadd.f32 1.0, %v3292_v27 }
 0x570   :  { %v3294_v31 = vpop.eup %3293  ;;  %v4014_v24 = vadd.f32 %v1447_v57, %v1443_v21  ;;  %3303 = vrcp.f32 %v1429_v20 }
 0x571   :  { %v3296_v34 = vpop.eup %3295  ;;  %v1442_v25 = vmul.f32 %v3294_v31, %v3970_v43  ;;  %3305 = vrcp.f32 %v1428_v23  ;;  %v1469_v23 = vld [vmem:[#allocation2 + $0x2c0] sm:$0xff] }
 0x572   :  { %v3298_v16 = vpop.eup %3297  ;;  %3307 = vtanh.f32 %v4014_v24  ;;  %v1431_v29 = vadd.f32 1.0, %v3296_v34  ;;  %v1472_v34 = vld [vmem:[#allocation2 + $0x2d8] sm:$0xff] }
 0x573   :  { %v4018_v30 = vadd.f32 %v1446_v18, %v1442_v25  ;;  %v1430_v39 = vadd.f32 1.0, %v3298_v16 }
 0x574   :  { %3309 = vrcp.f32 %v1431_v29 }
 0x575   :  { %3311 = vtanh.f32 %v4018_v30 }
 0x576   :  { %3313 = vrcp.f32 %v1430_v39 }
 0x578   :  { %v3300_v1 = vpop.eup %3299 }
 0x579   :  { %v3302_v32 = vpop.eup %3301 }
 0x57a   :  { %v3304_v33 = vpop.eup %3303 }
 0x57b   :  { %v3306_v35 = vpop.eup %3305  ;;  %v1457_v36 = vmul.f32 %v3304_v33, %v3300_v1 }
 0x57c   :  { %v3308_v37 = vpop.eup %3307  ;;  %v1456_v38 = vmul.f32 %v3306_v35, %v3302_v32  ;;  %v1471_v35 = vld [vmem:[#allocation2 + $0x2d0] sm:$0xff] }
 0x57e   :  { %v3310_v43 = vpop.eup %3309  ;;  %v2966_v45 = vpack.c.bf16 %v1457_v36, %v1456_v38 }
 0x57f   :  { %v3312_v49 = vpop.eup %3311  ;;  %v1459_v40 = vmul.f32 %v3310_v43, %v3308_v37  ;;  %v1474_v37 = vld [vmem:[#allocation2 + $0x2e8] sm:$0xff]  ;;  %v1473_v43 = vld [vmem:[#allocation2 + $0x2e0] sm:$0xff] }
 0x580   :  { %v3314_v41 = vpop.eup %3313  ;;  %2967 = vmatprep.subr.bf16.mxu1 %v2966_v45 }
 0x581   :  { %2969 = vmatpush3.bf16.msra.mxu1 %v2966_v45  ;;  %v1458_v42 = vmul.f32 %v3314_v41, %v3312_v49 }
 0x583   :  { %v2970_v61 = vpack.c.bf16 %v1459_v40, %v1458_v42 }
 0x585   :  { %2971 = vmatprep.subr.bf16.mxu1 %v2970_v61 }
 0x586   :  { %2973 = vmatpush3.bf16.msra.mxu1 %v2970_v61 }
 0x589   :  { %2847 = vmatmul.mubr.msk.f32.vlgmr.msra.gmra.mrb[32].mxu1 %vm58_vm0, %v3848_v26  ;;  %v1462_v26 = vld [vmem:[#allocation2 + $0x288] sm:$0xff] }
 0x58a   :  { %2849 = vmatprep.mubr.msk.f32.mxu1 %vm58_vm0, %v3855_v28  ;;  %v1461_v28 = vld [vmem:[#allocation2 + $0x280] sm:$0xff] }
 0x58d   :  { %2850 = vmatmul.mubr.msk.f32.gmra.mrb[34].mxu1 %vm58_vm0, %v3862_v2 }
 0x58e   :  { %2852 = vmatprep.mubr.msk.f32.mxu1 %vm58_vm0, %v3869_v3 }
 0x591   :  { %2853 = vmatmul.mubr.msk.f32.gmra.mrb[36].mxu1 %vm58_vm0, %v3876_v4 }
 0x592   :  { %2855 = vmatprep.mubr.msk.f32.mxu1 %vm58_vm0, %v3883_v5 }
 0x595   :  { %2856 = vmatmul.mubr.msk.f32.gmra.mrb[38].mxu1 %vm58_vm0, %v3890_v6  ;;  %v1464_v6 = vld [vmem:[#allocation2 + $0x298] sm:$0xff] }
 0x596   :  { %2858 = vmatprep.mubr.msk.f32.mxu1 %vm58_vm0, %v3897_v7 }
 0x599   :  { %2859 = vmatmul.mubr.msk.f32.gmra.mrb[40].mxu1 %vm58_vm0, %v3904_v8  ;;  %v1463_v8 = vld [vmem:[#allocation2 + $0x290] sm:$0xff] }
 0x59a   :  { %2861 = vmatprep.mubr.msk.f32.mxu1 %vm58_vm0, %v3911_v9 }
 0x59d   :  { %2862 = vmatmul.mubr.msk.f32.gmra.mrb[42].mxu1 %vm58_vm0, %v3918_v10 }
 0x59e   :  { %2864 = vmatprep.mubr.msk.f32.mxu1 %vm58_vm0, %v3925_v11 }
 0x5a1   :  { %2865 = vmatmul.mubr.msk.f32.gmra.mrb[44].mxu1 %vm58_vm0, %v3932_v12 }
 0x5a2   :  { %2867 = vmatprep.mubr.msk.f32.mxu1 %vm58_vm0, %v3939_v13 }
 0x5a5   :  { %2868 = vmatmul.mubr.msk.f32.gmra.mrb[46].mxu1 %vm58_vm0, %v3946_v14  ;;  %v1466_v14 = vld [vmem:[#allocation2 + $0x2a8] sm:$0xff] }
 0x5a6   :  { %2910 = vmatprep.mubr.msk.f32.mxu1 %vm58_vm0, %v3953_v15 }
 0x65c   :  { %v2848_v2 = vpop.f32.mrb[32].mxu1 }
 0x65d   :  { %v1623_v3 = vadd.f32 %v2848_v2, %v1462_v26  ;;  %v1543_v4 = vpop.f32.mrb[33].mxu1  ;;  %v1476_v2 = vld [vmem:[#allocation2 + $0x2f8] sm:$0xff] }
 0x65e   :  { %v1622_v5 = vadd.f32 %v1543_v4, %v1461_v28 }
 0x65f   :  { %v2460_v7 = vmul.f32 -1.442695, %v1623_v3 }
 0x660   :  { %v2459_v9 = vmul.f32 -1.442695, %v1622_v5  ;;  %v2851_v10 = vpop.f32.mrb[34].mxu1  ;;  %v1475_v5 = vld [vmem:[#allocation2 + $0x2f0] sm:$0xff] }
 0x661   :  { %3315 = vpow2.f32 %v2460_v7  ;;  %v1625_v11 = vadd.f32 %v2851_v10, %v1464_v6  ;;  %v1553_v12 = vpop.f32.mrb[35].mxu1 }
 0x662   :  { %3317 = vpow2.f32 %v2459_v9  ;;  %v1624_v13 = vadd.f32 %v1553_v12, %v1463_v8 }
 0x663   :  { %v2462_v44 = vmul.f32 -1.442695, %v1625_v11 }
 0x664   :  { %v2461_v15 = vmul.f32 -1.442695, %v1624_v13  ;;  %v2854_v48 = vpop.f32.mrb[36].mxu1 }
 0x665   :  { %3319 = vpow2.f32 %v2462_v44  ;;  %v1627_v51 = vadd.f32 %v2854_v48, %v1466_v14  ;;  %v1563_v52 = vpop.f32.mrb[37].mxu1 }
 0x666   :  { %3321 = vpow2.f32 %v2461_v15  ;;  %v1626_v53 = vadd.f32 %v1563_v52, %v1465_v46 }
 0x667   :  { %v2464_v58 = vmul.f32 -1.442695, %v1627_v51 }
 0x668   :  { %v2463_v50 = vmul.f32 -1.442695, %v1626_v53  ;;  %v2857_v0 = vpop.f32.mrb[38].mxu1 }
 0x669   :  { %3323 = vpow2.f32 %v2464_v58  ;;  %v1629_v56 = vadd.f32 %v2857_v0, %v1468_v54  ;;  %v1573_v57 = vpop.f32.mrb[39].mxu1 }
 0x66a   :  { %3325 = vpow2.f32 %v2463_v50  ;;  %v1628_v55 = vadd.f32 %v1573_v57, %v1467_v47 }
 0x66b   :  { %v3316_v60 = vpop.eup %3315  ;;  %v2466_v62 = vmul.f32 -1.442695, %v1629_v56 }
 0x66c   :  { %v3318_v63 = vpop.eup %3317  ;;  %v1651_v18 = vadd.f32 1.0, %v3316_v60  ;;  %v2465_v19 = vmul.f32 -1.442695, %v1628_v55  ;;  %v2860_v20 = vpop.f32.mrb[40].mxu1 }
 0x66d   :  { %v1650_v27 = vadd.f32 1.0, %v3318_v63  ;;  %3327 = vpow2.f32 %v2466_v62  ;;  %v1631_v21 = vadd.f32 %v2860_v20, %v1470_v22  ;;  %v1583_v31 = vpop.f32.mrb[41].mxu1 }
 0x66e   :  { %3329 = vrcp.f32 %v1651_v18  ;;  %v1630_v39 = vadd.f32 %v1583_v31, %v1469_v23 }
 0x66f   :  { %v3320_v25 = vpop.eup %3319  ;;  %3331 = vrcp.f32 %v1650_v27 }
 0x670   :  { %v3322_v16 = vpop.eup %3321  ;;  %v1653_v29 = vadd.f32 1.0, %v3320_v25  ;;  %3333 = vpow2.f32 %v2465_v19  ;;  %v2863_v1 = vpop.f32.mrb[42].mxu1 }
 0x671   :  { %v1652_v32 = vadd.f32 1.0, %v3322_v16  ;;  %3335 = vtanh.f32 %v1631_v21  ;;  %v1633_v33 = vadd.f32 %v2863_v1, %v1472_v34  ;;  %v1593_v36 = vpop.f32.mrb[43].mxu1 }
 0x672   :  { %3337 = vrcp.f32 %v1653_v29  ;;  %v1632_v40 = vadd.f32 %v1593_v36, %v1471_v35 }
 0x673   :  { %v3324_v38 = vpop.eup %3323  ;;  %3339 = vrcp.f32 %v1652_v32 }
 0x674   :  { %v3326_v45 = vpop.eup %3325  ;;  %v1675_v49 = vadd.f32 1.0, %v3324_v38  ;;  %3341 = vtanh.f32 %v1630_v39  ;;  %v2866_v41 = vpop.f32.mrb[44].mxu1 }
 0x675   :  { %v1674_v42 = vadd.f32 1.0, %v3326_v45  ;;  %3343 = vtanh.f32 %v1633_v33  ;;  %v1635_v61 = vadd.f32 %v2866_v41, %v1474_v37  ;;  %v1603_v26 = vpop.f32.mrb[45].mxu1 }
 0x676   :  { %3345 = vrcp.f32 %v1675_v49  ;;  %v1634_v28 = vadd.f32 %v1603_v26, %v1473_v43  ;;  %v4086_v26 = vld [vmem:[%s4240_s1 + $0x18] sm:$0xff] }
 0x677   :  { %v3328_v3 = vpop.eup %3327  ;;  %3347 = vrcp.f32 %v1674_v42  ;;  %v2468_v4 = vmul.f32 -1.442695, %v1635_v61  ;;  %v4072_v42 = vld [vmem:[%s4240_s1 + $0x8] sm:$0xff]  ;;  %v4079_v61 = vld [vmem:[%s4240_s1 + $0x10] sm:$0xff] }
 0x678   :  { %v3330_v6 = vpop.eup %3329  ;;  %v1677_v7 = vadd.f32 1.0, %v3328_v3  ;;  %3349 = vtanh.f32 %v1632_v40  ;;  %v2467_v8 = vmul.f32 -1.442695, %v1634_v28  ;;  %v2869_v9 = vpop.f32.mrb[46].mxu1  ;;  %v4093_v28 = vld [vmem:[%s4240_s1 + $0x20] sm:$0xff]  ;;  %v4107_v3 = vld [vmem:[%s4240_s1 + $0x30] sm:$0xff] }
 0x679   :  { %v3332_v10 = vpop.eup %3331  ;;  %3351 = vpow2.f32 %v2468_v4  ;;  %v1637_v11 = vadd.f32 %v2869_v9, %v1476_v2  ;;  %v1613_v12 = vpop.f32.mrb[47].mxu1  ;;  %v4100_v2 = vld [vmem:[%s4240_s1 + $0x28] sm:$0xff]  ;;  %v4114_v4 = vld [vmem:[%s4240_s1 + $0x38] sm:$0xff]  ;;  %v4149_v9 = vld [vmem:[%s4240_s1 + $0x60] sm:$0xff] }
 0x67a   :  { %v3334_v13 = vpop.eup %3333  ;;  %3353 = vrcp.f32 %v1677_v7  ;;  %v1636_v14 = vadd.f32 %v1613_v12, %v1475_v5  ;;  %v4121_v5 = vld [vmem:[%s4240_s1 + $0x40] sm:$0xff]  ;;  %v4135_v7 = vld [vmem:[%s4240_s1 + $0x50] sm:$0xff]  ;;  %v4170_v12 = vld [vmem:[%s4240_s1 + $0x78] sm:$0xff] }
 0x67b   :  { %v3336_v44 = vpop.eup %3335  ;;  %v1676_v46 = vadd.f32 1.0, %v3334_v13  ;;  %3355 = vpow2.f32 %v2467_v8  ;;  %v2470_v15 = vmul.f32 -1.442695, %v1637_v11  ;;  %v4142_v8 = vld [vmem:[%s4240_s1 + $0x58] sm:$0xff]  ;;  %v4163_v11 = vld [vmem:[%s4240_s1 + $0x70] sm:$0xff]  ;;  %v1736_v13 = vld [vmem:[#allocation2 + $0x308] sm:$0xff] }
 0x67c   :  { %v3338_v48 = vpop.eup %3337  ;;  %v1719_v51 = vmul.f32 %v3336_v44, %v3330_v6  ;;  %v2469_v52 = vmul.f32 -1.442695, %v1636_v14  ;;  %v4128_v6 = vld [vmem:[%s4240_s1 + $0x48] sm:$0xff]  ;;  %v1735_v14 = vld [vmem:[#allocation2 + $0x300] sm:$0xff] }
 0x67d   :  { %v3340_v53 = vpop.eup %3339  ;;  %3357 = vrcp.f32 %v1676_v46 }
 0x67e   :  { %v3342_v54 = vpop.eup %3341  ;;  %3359 = vpow2.f32 %v2470_v15 }
 0x67f   :  { %v3344_v58 = vpop.eup %3343  ;;  %v1718_v47 = vmul.f32 %v3342_v54, %v3332_v10  ;;  %3361 = vpow2.f32 %v2469_v52  ;;  %v4156_v10 = vld [vmem:[%s4240_s1 + $0x68] sm:$0xff]  ;;  %s3590_s1 = smov [#allocation5]  }
 0x680   :  { %v3346_v50 = vpop.eup %3345  ;;  %v1721_v0 = vmul.f32 %v3344_v58, %v3338_v48  ;;  %s2291_s7 = sshll.u32 %s3590_s1, 4  ;;  %s2292_s7 = int_to_ptr.vmem [resolvable:$true] %s2291_s7 }
 0x681   :  { %v3348_v56 = vpop.eup %3347  ;;  %v1715_v57 = vmul.f32 %v3346_v50, %v4007_v17  ;;  %s3560_s8 = scalar_lea.vmem %s2292_s7, 512  ;;  %p3565_p9 = scmp.lt.s32.totalorder %s2292_s7, %s2292_s7 }
 0x682   :  { %v3350_v55 = vpop.eup %3349  ;;  %v1714_v22 = vmul.f32 %v3348_v56, %v4009_v59  ;;  %v1740_v56 = vld [vmem:[#allocation2 + $0x328] sm:$0xff]  ;;  %p3561_p8 = scmp.ne.s32.totalorder %s2292_s7, %s3560_s8  ;;  %p3566_p10 = scmp.lt.s32.totalorder %s3560_s8, %s3560_s8 }
 0x683   :  { %v3352_v60 = vpop.eup %3351  ;;  %v4055_v62 = vadd.f32 %v1719_v51, %v1715_v57  ;;  %v1720_v63 = vmul.f32 %v3350_v55, %v3340_v53  ;;  %v1738_v51 = vld [vmem:[#allocation2 + $0x318] sm:$0xff]  ;;  %v1737_v53 = vld [vmem:[#allocation2 + $0x310] sm:$0xff]  ;;  %v1739_v55 = vld [vmem:[#allocation2 + $0x320] sm:$0xff] }
 0x684   :  { %v3354_v18 = vpop.eup %3353  ;;  %v4057_v19 = vadd.f32 %v1718_v47, %v1714_v22  ;;  %v1703_v20 = vadd.f32 1.0, %v3352_v60  ;;  %p3567_p11 = por %p3566_p10, %p3565_p9 }
 0x685   :  { %v3356_v27 = vpop.eup %3355  ;;  %v1717_v21 = vmul.f32 %v3354_v18, %v4014_v24  ;;  %3363 = vtanh.f32 %v4055_v62 }
 0x686   :  { %3365 = vtanh.f32 %v4057_v19  ;;  %v1702_v23 = vadd.f32 1.0, %v3356_v27  ;;  %v1742_v27 = vld [vmem:[#allocation2 + $0x338] sm:$0xff]  ;;  %p3568_p12 = pnand %p3567_p11, %p3561_p8 }
 0x687   :  { %v3358_v17 = vpop.eup %3357  ;;  %v4062_v31 = vadd.f32 %v1721_v0, %v1717_v21  ;;  %3367 = vrcp.f32 %v1703_v20 }
 0x688   :  { %v3360_v59 = vpop.eup %3359  ;;  %v1716_v34 = vmul.f32 %v3358_v17, %v4018_v30  ;;  %3369 = vrcp.f32 %v1702_v23  ;;  %v1741_v23 = vld [vmem:[#allocation2 + $0x330] sm:$0xff] }
 0x689   :  { %v3362_v25 = vpop.eup %3361  ;;  %3371 = vtanh.f32 %v4062_v31  ;;  %v1705_v16 = vadd.f32 1.0, %v3360_v59 }
 0x68a   :  { %v4066_v29 = vadd.f32 %v1720_v63, %v1716_v34  ;;  %v1704_v24 = vadd.f32 1.0, %v3362_v25 }
 0x68b   :  { %3373 = vrcp.f32 %v1705_v16 }
 0x68c   :  { %3375 = vtanh.f32 %v4066_v29 }
 0x68d   :  { %3377 = vrcp.f32 %v1704_v24  ;;  %v1744_v24 = vld [vmem:[#allocation2 + $0x348] sm:$0xff] }
 0x68f   :  { %v3364_v39 = vpop.eup %3363 }
 0x690   :  { %v3366_v1 = vpop.eup %3365 }
 0x691   :  { %v3368_v32 = vpop.eup %3367 }
 0x692   :  { %v3370_v33 = vpop.eup %3369  ;;  %v1731_v35 = vmul.f32 %v3368_v32, %v3364_v39 }
 0x693   :  { %v3372_v36 = vpop.eup %3371  ;;  %v1730_v37 = vmul.f32 %v3370_v33, %v3366_v1 }
 0x695   :  { %v3374_v30 = vpop.eup %3373  ;;  %v2974_v38 = vpack.c.bf16 %v1731_v35, %v1730_v37 }
 0x696   :  { %v3376_v43 = vpop.eup %3375  ;;  %v1733_v45 = vmul.f32 %v3374_v30, %v3372_v36 }
 0x697   :  { %v3378_v49 = vpop.eup %3377  ;;  %2975 = vmatprep.subr.bf16.mxu0 %v2974_v38 }
 0x698   :  { %2977 = vmatpush3.bf16.msra.mxu0 %v2974_v38  ;;  %v1732_v40 = vmul.f32 %v3378_v49, %v3376_v43  ;;  %v1743_v38 = vld [vmem:[#allocation2 + $0x340] sm:$0xff] }
 0x69a   :  { %v2978_v41 = vpack.c.bf16 %v1733_v45, %v1732_v40  ;;  %v1746_v45 = vld [vmem:[#allocation2 + $0x358] sm:$0xff] }
 0x69c   :  { %2979 = vmatprep.subr.bf16.mxu0 %v2978_v41 }
 0x69d   :  { %2981 = vmatpush3.bf16.msra.mxu0 %v2978_v41 }
 0x6a0   :  { %2879 = vmatmul.mubr.msk.f32.vlgmr.msra.gmra.mrb[48].mxu0 %vm58_vm0, %v4072_v42 }
 0x6a1   :  { %2881 = vmatprep.mubr.msk.f32.mxu0 %vm58_vm0, %v4079_v61 }
 0x6a4   :  { %2882 = vmatmul.mubr.msk.f32.gmra.mrb[50].mxu0 %vm58_vm0, %v4086_v26 }
 0x6a5   :  { %2884 = vmatprep.mubr.msk.f32.mxu0 %vm58_vm0, %v4093_v28 }
 0x6a8   :  { %2885 = vmatmul.mubr.msk.f32.gmra.mrb[52].mxu0 %vm58_vm0, %v4100_v2 }
 0x6a9   :  { %2887 = vmatprep.mubr.msk.f32.mxu0 %vm58_vm0, %v4107_v3 }
 0x6ac   :  { %2888 = vmatmul.mubr.msk.f32.gmra.mrb[54].mxu0 %vm58_vm0, %v4114_v4 }
 0x6ad   :  { %2890 = vmatprep.mubr.msk.f32.mxu0 %vm58_vm0, %v4121_v5 }
 0x6b0   :  { %2891 = vmatmul.mubr.msk.f32.gmra.mrb[56].mxu0 %vm58_vm0, %v4128_v6 }
 0x6b1   :  { %2893 = vmatprep.mubr.msk.f32.mxu0 %vm58_vm0, %v4135_v7 }
 0x6b4   :  { %2894 = vmatmul.mubr.msk.f32.gmra.mrb[58].mxu0 %vm58_vm0, %v4142_v8 }
 0x6b5   :  { %2896 = vmatprep.mubr.msk.f32.mxu0 %vm58_vm0, %v4149_v9 }
 0x6b8   :  { %2897 = vmatmul.mubr.msk.f32.gmra.mrb[60].mxu0 %vm58_vm0, %v4156_v10 }
 0x6b9   :  { %2899 = vmatprep.mubr.msk.f32.mxu0 %vm58_vm0, %v4163_v11 }
 0x6bc   :  { %2900 = vmatmul.mubr.msk.f32.gmra.mrb[62].mxu0 %vm58_vm0, %v4170_v12 }
 0x773   :  { %v2880_v44 = vpop.f32.mrb[48].mxu0 }
 0x774   :  { %v1897_v46 = vadd.f32 %v2880_v44, %v1736_v13  ;;  %v1817_v15 = vpop.f32.mrb[49].mxu0 }
 0x775   :  { %v1896_v48 = vadd.f32 %v1817_v15, %v1735_v14  ;;  %v1745_v15 = vld [vmem:[#allocation2 + $0x350] sm:$0xff] }
 0x776   :  { %v2488_v52 = vmul.f32 -1.442695, %v1897_v46 }
 0x777   :  { %v2487_v54 = vmul.f32 -1.442695, %v1896_v48  ;;  %v2883_v58 = vpop.f32.mrb[50].mxu0 }
 0x778   :  { %3379 = vpow2.f32 %v2488_v52  ;;  %v1899_v47 = vadd.f32 %v2883_v58, %v1738_v51  ;;  %v1827_v50 = vpop.f32.mrb[51].mxu0  ;;  %v1748_v51 = vld [vmem:[#allocation2 + $0x368] sm:$0xff] }
 0x779   :  { %3381 = vpow2.f32 %v2487_v54  ;;  %v1898_v0 = vadd.f32 %v1827_v50, %v1737_v53  ;;  %v1747_v53 = vld [vmem:[#allocation2 + $0x360] sm:$0xff] }
 0x77a   :  { %v2490_v57 = vmul.f32 -1.442695, %v1899_v47 }
 0x77b   :  { %v2489_v22 = vmul.f32 -1.442695, %v1898_v0  ;;  %v2886_v60 = vpop.f32.mrb[52].mxu0 }
 0x77c   :  { %3383 = vpow2.f32 %v2490_v57  ;;  %v1901_v63 = vadd.f32 %v2886_v60, %v1740_v56  ;;  %v1837_v18 = vpop.f32.mrb[53].mxu0 }
 0x77d   :  { %3385 = vpow2.f32 %v2489_v22  ;;  %v1900_v20 = vadd.f32 %v1837_v18, %v1739_v55  ;;  %v1750_v22 = vld [vmem:[#allocation2 + $0x378] sm:$0xff]  ;;  %v1749_v18 = vld [vmem:[#allocation2 + $0x370] sm:$0xff] }
 0x77e   :  { %v2492_v21 = vmul.f32 -1.442695, %v1901_v63 }
 0x77f   :  { %v2491_v17 = vmul.f32 -1.442695, %v1900_v20  ;;  %v2889_v59 = vpop.f32.mrb[54].mxu0 }
 0x780   :  { %3387 = vpow2.f32 %v2492_v21  ;;  %v1903_v34 = vadd.f32 %v2889_v59, %v1742_v27  ;;  %v1847_v25 = vpop.f32.mrb[55].mxu0 }
 0x781   :  { %3389 = vpow2.f32 %v2491_v17  ;;  %v1902_v16 = vadd.f32 %v1847_v25, %v1741_v23 }
 0x782   :  { %v3380_v39 = vpop.eup %3379  ;;  %v2494_v1 = vmul.f32 -1.442695, %v1903_v34 }
 0x783   :  { %v3382_v32 = vpop.eup %3381  ;;  %v1925_v33 = vadd.f32 1.0, %v3380_v39  ;;  %v2493_v35 = vmul.f32 -1.442695, %v1902_v16  ;;  %v2892_v36 = vpop.f32.mrb[56].mxu0 }
 0x784   :  { %v1924_v37 = vadd.f32 1.0, %v3382_v32  ;;  %3391 = vpow2.f32 %v2494_v1  ;;  %v1905_v30 = vadd.f32 %v2892_v36, %v1744_v24  ;;  %v1857_v43 = vpop.f32.mrb[57].mxu0 }
 0x785   :  { %3393 = vrcp.f32 %v1925_v33  ;;  %v1904_v13 = vadd.f32 %v1857_v43, %v1743_v38 }
 0x786   :  { %v3384_v49 = vpop.eup %3383  ;;  %3395 = vrcp.f32 %v1924_v37 }
 0x787   :  { %v3386_v40 = vpop.eup %3385  ;;  %v1927_v41 = vadd.f32 1.0, %v3384_v49  ;;  %3397 = vpow2.f32 %v2493_v35  ;;  %v2895_v14 = vpop.f32.mrb[58].mxu0 }
 0x788   :  { %v1926_v44 = vadd.f32 1.0, %v3386_v40  ;;  %3399 = vtanh.f32 %v1905_v30  ;;  %v1907_v46 = vadd.f32 %v2895_v14, %v1746_v45  ;;  %v1867_v48 = vpop.f32.mrb[59].mxu0 }
 0x789   :  { %3401 = vrcp.f32 %v1927_v41  ;;  %v1906_v47 = vadd.f32 %v1867_v48, %v1745_v15 }
 0x78a   :  { %v3388_v52 = vpop.eup %3387  ;;  %3403 = vrcp.f32 %v1926_v44 }
 0x78b   :  { %v3390_v54 = vpop.eup %3389  ;;  %v1949_v58 = vadd.f32 1.0, %v3388_v52  ;;  %3405 = vtanh.f32 %v1904_v13  ;;  %v2898_v50 = vpop.f32.mrb[60].mxu0 }
 0x78c   :  { %v1948_v0 = vadd.f32 1.0, %v3390_v54  ;;  %3407 = vtanh.f32 %v1907_v46  ;;  %v1909_v56 = vadd.f32 %v2898_v50, %v1748_v51  ;;  %v1877_v57 = vpop.f32.mrb[61].mxu0 }
 0x78d   :  { %3409 = vrcp.f32 %v1949_v58  ;;  %v1908_v55 = vadd.f32 %v1877_v57, %v1747_v53 }
 0x78e   :  { %v3392_v60 = vpop.eup %3391  ;;  %3411 = vrcp.f32 %v1948_v0  ;;  %v2496_v63 = vmul.f32 -1.442695, %v1909_v56 }
 0x78f   :  { %v3394_v20 = vpop.eup %3393  ;;  %v1951_v27 = vadd.f32 1.0, %v3392_v60  ;;  %3413 = vtanh.f32 %v1906_v47  ;;  %v2495_v21 = vmul.f32 -1.442695, %v1908_v55  ;;  %v2901_v23 = vpop.f32.mrb[62].mxu0 }
 0x790   :  { %v3396_v17 = vpop.eup %3395  ;;  %3415 = vpow2.f32 %v2496_v63  ;;  %v1911_v59 = vadd.f32 %v2901_v23, %v1750_v22  ;;  %v1887_v34 = vpop.f32.mrb[63].mxu0 }
 0x791   :  { %v3398_v25 = vpop.eup %3397  ;;  %3417 = vrcp.f32 %v1951_v27  ;;  %v1910_v16 = vadd.f32 %v1887_v34, %v1749_v18 }
 0x792   :  { %v3400_v24 = vpop.eup %3399  ;;  %v1950_v39 = vadd.f32 1.0, %v3398_v25  ;;  %3419 = vpow2.f32 %v2495_v21  ;;  %v2498_v1 = vmul.f32 -1.442695, %v1911_v59 }
 0x793   :  { %v3402_v32 = vpop.eup %3401  ;;  %v1993_v33 = vmul.f32 %v3400_v24, %v3394_v20  ;;  %v2497_v35 = vmul.f32 -1.442695, %v1910_v16  ;;  %v2013_v24 = vld [vmem:[#allocation2 + $0x3a0] sm:$0xff] }
 0x794   :  { %v3404_v36 = vpop.eup %3403  ;;  %3421 = vrcp.f32 %v1950_v39 }
 0x795   :  { %v3406_v37 = vpop.eup %3405  ;;  %3423 = vpow2.f32 %v2498_v1 }
 0x796   :  { %v3408_v30 = vpop.eup %3407  ;;  %v1992_v38 = vmul.f32 %v3406_v37, %v3396_v17  ;;  %3425 = vpow2.f32 %v2497_v35  ;;  %v2016_v35 = vld [vmem:[#allocation2 + $0x3b8] sm:$0xff]  ;;  %v2015_v37 = vld [vmem:[#allocation2 + $0x3b0] sm:$0xff] }
 0x797   :  { %v3410_v43 = vpop.eup %3409  ;;  %v1995_v45 = vmul.f32 %v3408_v30, %v3402_v32 }
 0x798   :  { %v3412_v49 = vpop.eup %3411  ;;  %v1989_v40 = vmul.f32 %v3410_v43, %v4055_v62 }
 0x799   :  { %v3414_v41 = vpop.eup %3413  ;;  %v1988_v13 = vmul.f32 %v3412_v49, %v4057_v19 }
 0x79a   :  { %v3416_v14 = vpop.eup %3415  ;;  %v4176_v44 = vadd.f32 %v1993_v33, %v1989_v40  ;;  %v1994_v46 = vmul.f32 %v3414_v41, %v3404_v36  ;;  %v2018_v40 = vld [vmem:[#allocation2 + $0x3c8] sm:$0xff] }
 0x79b   :  { %v3418_v15 = vpop.eup %3417  ;;  %v4178_v48 = vadd.f32 %v1992_v38, %v1988_v13  ;;  %v1977_v51 = vadd.f32 1.0, %v3416_v14 }
 0x79c   :  { %v3420_v52 = vpop.eup %3419  ;;  %v1991_v53 = vmul.f32 %v3418_v15, %v4062_v31  ;;  %3427 = vtanh.f32 %v4176_v44 }
 0x79d   :  { %3429 = vtanh.f32 %v4178_v48  ;;  %v1976_v54 = vadd.f32 1.0, %v3420_v52 }
 0x79e   :  { %v3422_v62 = vpop.eup %3421  ;;  %v4183_v58 = vadd.f32 %v1995_v45, %v1991_v53  ;;  %3431 = vrcp.f32 %v1977_v51 }
 0x79f   :  { %v3424_v19 = vpop.eup %3423  ;;  %v1990_v47 = vmul.f32 %v3422_v62, %v4066_v29  ;;  %3433 = vrcp.f32 %v1976_v54  ;;  %v2017_v54 = vld [vmem:[#allocation2 + $0x3c0] sm:$0xff] }
 0x7a0   :  { %v3426_v50 = vpop.eup %3425  ;;  %3435 = vtanh.f32 %v4183_v58  ;;  %v1979_v0 = vadd.f32 1.0, %v3424_v19  ;;  %v2020_v19 = vld [vmem:[#allocation2 + $0x3d8] sm:$0xff] }
 0x7a1   :  { %v4187_v56 = vadd.f32 %v1994_v46, %v1990_v47  ;;  %v1978_v31 = vadd.f32 1.0, %v3426_v50 }
 0x7a2   :  { %3437 = vrcp.f32 %v1979_v0 }
 0x7a3   :  { %3439 = vtanh.f32 %v4187_v56 }
 0x7a4   :  { %3441 = vrcp.f32 %v1978_v31 }
 0x7a6   :  { %v3428_v57 = vpop.eup %3427 }
 0x7a7   :  { %v3430_v55 = vpop.eup %3429 }
 0x7a8   :  { %v3432_v22 = vpop.eup %3431 }
 0x7a9   :  { %v3434_v60 = vpop.eup %3433  ;;  %v2005_v63 = vmul.f32 %v3432_v22, %v3428_v57 }
 0x7aa   :  { %v3436_v18 = vpop.eup %3435  ;;  %v2004_v20 = vmul.f32 %v3434_v60, %v3430_v55  ;;  %v2019_v60 = vld [vmem:[#allocation2 + $0x3d0] sm:$0xff] }
 0x7ac   :  { %v3438_v29 = vpop.eup %3437  ;;  %v2982_v27 = vpack.c.bf16 %v2005_v63, %v2004_v20 }
 0x7ad   :  { %v3440_v21 = vpop.eup %3439  ;;  %v2007_v23 = vmul.f32 %v3438_v29, %v3436_v18  ;;  %v2022_v18 = vld [vmem:[#allocation2 + $0x3e8] sm:$0xff]  ;;  %v2021_v29 = vld [vmem:[#allocation2 + $0x3e0] sm:$0xff] }
 0x7ae   :  { %v3442_v17 = vpop.eup %3441  ;;  %2983 = vmatprep.subr.bf16.mxu1 %v2982_v27 }
 0x7af   :  { %2985 = vmatpush3.bf16.msra.mxu1 %v2982_v27  ;;  %v2006_v59 = vmul.f32 %v3442_v17, %v3440_v21 }
 0x7b1   :  { %v2986_v34 = vpack.c.bf16 %v2007_v23, %v2006_v59 }
 0x7b3   :  { %2987 = vmatprep.subr.bf16.mxu1 %v2986_v34 }
 0x7b4   :  { %2989 = vmatpush3.bf16.msra.mxu1 %v2986_v34 }
 0x7b7   :  { %2911 = vmatmul.mubr.msk.f32.vlgmr.msra.gmra.mrb[48].mxu1 %vm58_vm0, %v4072_v42  ;;  %v2010_v42 = vld [vmem:[#allocation2 + $0x388] sm:$0xff] }
 0x7b8   :  { %2913 = vmatprep.mubr.msk.f32.mxu1 %vm58_vm0, %v4079_v61  ;;  %v2009_v61 = vld [vmem:[#allocation2 + $0x380] sm:$0xff] }
 0x7bb   :  { %2914 = vmatmul.mubr.msk.f32.gmra.mrb[50].mxu1 %vm58_vm0, %v4086_v26 }
 0x7bc   :  { %2916 = vmatprep.mubr.msk.f32.mxu1 %vm58_vm0, %v4093_v28 }
 0x7bf   :  { %2917 = vmatmul.mubr.msk.f32.gmra.mrb[52].mxu1 %vm58_vm0, %v4100_v2 }
 0x7c0   :  { %2919 = vmatprep.mubr.msk.f32.mxu1 %vm58_vm0, %v4107_v3 }
 0x7c3   :  { %2920 = vmatmul.mubr.msk.f32.gmra.mrb[54].mxu1 %vm58_vm0, %v4114_v4  ;;  %v2012_v4 = vld [vmem:[#allocation2 + $0x398] sm:$0xff] }
 0x7c4   :  { %2922 = vmatprep.mubr.msk.f32.mxu1 %vm58_vm0, %v4121_v5 }
 0x7c7   :  { %2923 = vmatmul.mubr.msk.f32.gmra.mrb[56].mxu1 %vm58_vm0, %v4128_v6  ;;  %v2011_v6 = vld [vmem:[#allocation2 + $0x390] sm:$0xff] }
 0x7c8   :  { %2925 = vmatprep.mubr.msk.f32.mxu1 %vm58_vm0, %v4135_v7 }
 0x7cb   :  { %2926 = vmatmul.mubr.msk.f32.gmra.mrb[58].mxu1 %vm58_vm0, %v4142_v8 }
 0x7cc   :  { %2928 = vmatprep.mubr.msk.f32.mxu1 %vm58_vm0, %v4149_v9 }
 0x7cf   :  { %2929 = vmatmul.mubr.msk.f32.gmra.mrb[60].mxu1 %vm58_vm0, %v4156_v10 }
 0x7d0   :  { %2931 = vmatprep.mubr.msk.f32.mxu1 %vm58_vm0, %v4163_v11  ;;  %v2014_v11 = vld [vmem:[#allocation2 + $0x3a8] sm:$0xff] }
 0x7d3   :  { %2932 = vmatmul.mubr.msk.f32.gmra.mrb[62].mxu1 %vm58_vm0, %v4170_v12 }
 0x88a   :  { %v2912_v26 = vpop.f32.mrb[48].mxu1 }
 0x88b   :  { %v2171_v28 = vadd.f32 %v2912_v26, %v2010_v42  ;;  %v2091_v2 = vpop.f32.mrb[49].mxu1  ;;  %v2024_v26 = vld [vmem:[#allocation2 + $0x3f8] sm:$0xff] }
 0x88c   :  { %v2170_v3 = vadd.f32 %v2091_v2, %v2009_v61 }
 0x88d   :  { %v2516_v5 = vmul.f32 -1.442695, %v2171_v28 }
 0x88e   :  { %v2515_v7 = vmul.f32 -1.442695, %v2170_v3  ;;  %v2915_v8 = vpop.f32.mrb[50].mxu1  ;;  %v2023_v3 = vld [vmem:[#allocation2 + $0x3f0] sm:$0xff] }
 0x88f   :  { %3443 = vpow2.f32 %v2516_v5  ;;  %v2173_v9 = vadd.f32 %v2915_v8, %v2012_v4  ;;  %v2101_v10 = vpop.f32.mrb[51].mxu1 }
 0x890   :  { %3445 = vpow2.f32 %v2515_v7  ;;  %v2172_v25 = vadd.f32 %v2101_v10, %v2011_v6 }
 0x891   :  { %v2518_v16 = vmul.f32 -1.442695, %v2173_v9 }
 0x892   :  { %v2517_v12 = vmul.f32 -1.442695, %v2172_v25  ;;  %v2918_v39 = vpop.f32.mrb[52].mxu1 }
 0x893   :  { %3447 = vpow2.f32 %v2518_v16  ;;  %v2175_v1 = vadd.f32 %v2918_v39, %v2014_v11  ;;  %v2111_v32 = vpop.f32.mrb[53].mxu1 }
 0x894   :  { %3449 = vpow2.f32 %v2517_v12  ;;  %v2174_v33 = vadd.f32 %v2111_v32, %v2013_v24 }
 0x895   :  { %v2520_v36 = vmul.f32 -1.442695, %v2175_v1 }
 0x896   :  { %v2519_v30 = vmul.f32 -1.442695, %v2174_v33  ;;  %v2921_v38 = vpop.f32.mrb[54].mxu1 }
 0x897   :  { %3451 = vpow2.f32 %v2520_v36  ;;  %v2177_v43 = vadd.f32 %v2921_v38, %v2016_v35  ;;  %v2121_v45 = vpop.f32.mrb[55].mxu1 }
 0x898   :  { %3453 = vpow2.f32 %v2519_v30  ;;  %v2176_v49 = vadd.f32 %v2121_v45, %v2015_v37 }
 0x899   :  { %v3444_v41 = vpop.eup %3443  ;;  %v2522_v13 = vmul.f32 -1.442695, %v2177_v43 }
 0x89a   :  { %v3446_v14 = vpop.eup %3445  ;;  %v2199_v46 = vadd.f32 1.0, %v3444_v41  ;;  %v2521_v15 = vmul.f32 -1.442695, %v2176_v49  ;;  %v2924_v51 = vpop.f32.mrb[56].mxu1 }
 0x89b   :  { %v2198_v52 = vadd.f32 1.0, %v3446_v14  ;;  %3455 = vpow2.f32 %v2522_v13  ;;  %v2179_v53 = vadd.f32 %v2924_v51, %v2018_v40  ;;  %v2131_v62 = vpop.f32.mrb[57].mxu1 }
 0x89c   :  { %3457 = vrcp.f32 %v2199_v46  ;;  %v2178_v31 = vadd.f32 %v2131_v62, %v2017_v54 }
 0x89d   :  { %v3448_v47 = vpop.eup %3447  ;;  %3459 = vrcp.f32 %v2198_v52 }
 0x89e   :  { %v3450_v50 = vpop.eup %3449  ;;  %v2201_v0 = vadd.f32 1.0, %v3448_v47  ;;  %3461 = vpow2.f32 %v2521_v15  ;;  %v2927_v57 = vpop.f32.mrb[58].mxu1 }
 0x89f   :  { %v2200_v55 = vadd.f32 1.0, %v3450_v50  ;;  %3463 = vtanh.f32 %v2179_v53  ;;  %v2181_v22 = vadd.f32 %v2927_v57, %v2020_v19  ;;  %v2141_v63 = vpop.f32.mrb[59].mxu1 }
 0x8a0   :  { %3465 = vrcp.f32 %v2201_v0  ;;  %v2180_v23 = vadd.f32 %v2141_v63, %v2019_v60 }
 0x8a1   :  { %v3452_v20 = vpop.eup %3451  ;;  %3467 = vrcp.f32 %v2200_v55 }
 0x8a2   :  { %v3454_v27 = vpop.eup %3453  ;;  %v2223_v21 = vadd.f32 1.0, %v3452_v20  ;;  %3469 = vtanh.f32 %v2178_v31  ;;  %v2930_v17 = vpop.f32.mrb[60].mxu1 }
 0x8a3   :  { %v2222_v59 = vadd.f32 1.0, %v3454_v27  ;;  %3471 = vtanh.f32 %v2181_v22  ;;  %v2183_v34 = vadd.f32 %v2930_v17, %v2022_v18  ;;  %v2151_v42 = vpop.f32.mrb[61].mxu1 }
 0x8a4   :  { %3473 = vrcp.f32 %v2223_v21  ;;  %v2182_v61 = vadd.f32 %v2151_v42, %v2021_v29 }
 0x8a5   :  { %v3456_v28 = vpop.eup %3455  ;;  %3475 = vrcp.f32 %v2222_v59  ;;  %v2524_v2 = vmul.f32 -1.442695, %v2183_v34 }
 0x8a6   :  { %v3458_v4 = vpop.eup %3457  ;;  %v2225_v5 = vadd.f32 1.0, %v3456_v28  ;;  %3477 = vtanh.f32 %v2180_v23  ;;  %v2523_v6 = vmul.f32 -1.442695, %v2182_v61  ;;  %v2933_v7 = vpop.f32.mrb[62].mxu1 }
 0x8a7   :  { %v3460_v8 = vpop.eup %3459  ;;  %3479 = vpow2.f32 %v2524_v2  ;;  %v2185_v9 = vadd.f32 %v2933_v7, %v2024_v26  ;;  %v2161_v10 = vpop.f32.mrb[63].mxu1 }
 0x8a8   :  { %v3462_v25 = vpop.eup %3461  ;;  %3481 = vrcp.f32 %v2225_v5  ;;  %v2184_v11 = vadd.f32 %v2161_v10, %v2023_v3 }
 0x8a9   :  { %v3464_v16 = vpop.eup %3463  ;;  %v2224_v24 = vadd.f32 1.0, %v3462_v25  ;;  %3483 = vpow2.f32 %v2523_v6  ;;  %v2526_v12 = vmul.f32 -1.442695, %v2185_v9 }
 0x8aa   :  { %v3466_v39 = vpop.eup %3465  ;;  %v2267_v1 = vmul.f32 %v3464_v16, %v3458_v4  ;;  %v2525_v32 = vmul.f32 -1.442695, %v2184_v11 }
 0x8ab   :  { %v3468_v33 = vpop.eup %3467  ;;  %3485 = vrcp.f32 %v2224_v24 }
 0x8ac   :  { %v3470_v35 = vpop.eup %3469  ;;  %3487 = vpow2.f32 %v2526_v12 }
 0x8ad   :  { %v3472_v36 = vpop.eup %3471  ;;  %v2266_v37 = vmul.f32 %v3470_v35, %v3460_v8  ;;  %3489 = vpow2.f32 %v2525_v32 }
 0x8ae   :  { %v3474_v30 = vpop.eup %3473  ;;  %v2269_v38 = vmul.f32 %v3472_v36, %v3466_v39 }
 0x8af   :  { %v3476_v43 = vpop.eup %3475  ;;  %v2263_v45 = vmul.f32 %v3474_v30, %v4176_v44 }
 0x8b0   :  { %v3478_v49 = vpop.eup %3477  ;;  %v2262_v40 = vmul.f32 %v3476_v43, %v4178_v48 }
 0x8b1   :  { %v3480_v41 = vpop.eup %3479  ;;  %v2271_v13 = vadd.f32 %v2267_v1, %v2263_v45  ;;  %v2268_v14 = vmul.f32 %v3478_v49, %v3468_v33 }
 0x8b2   :  { %v3482_v46 = vpop.eup %3481  ;;  %v2270_v15 = vadd.f32 %v2266_v37, %v2262_v40  ;;  %v2251_v51 = vadd.f32 1.0, %v3480_v41 }
 0x8b3   :  { %v3484_v52 = vpop.eup %3483  ;;  %v2265_v53 = vmul.f32 %v3482_v46, %v4183_v58  ;;  %3491 = vtanh.f32 %v2271_v13 }
 0x8b4   :  { %3493 = vtanh.f32 %v2270_v15  ;;  %v2250_v54 = vadd.f32 1.0, %v3484_v52 }
 0x8b5   :  { %v3486_v62 = vpop.eup %3485  ;;  %v2273_v19 = vadd.f32 %v2269_v38, %v2265_v53  ;;  %3495 = vrcp.f32 %v2251_v51 }
 0x8b6   :  { %v3488_v47 = vpop.eup %3487  ;;  %v2264_v44 = vmul.f32 %v3486_v62, %v4187_v56  ;;  %3497 = vrcp.f32 %v2250_v54 }
 0x8b7   :  { %v3490_v48 = vpop.eup %3489  ;;  %3499 = vtanh.f32 %v2273_v19  ;;  %v2253_v50 = vadd.f32 1.0, %v3488_v47 }
 0x8b8   :  { %v2272_v0 = vadd.f32 %v2268_v14, %v2264_v44  ;;  %v2252_v31 = vadd.f32 1.0, %v3490_v48 }
 0x8b9   :  { %3501 = vrcp.f32 %v2253_v50 }
 0x8ba   :  { %3503 = vtanh.f32 %v2272_v0 }
 0x8bb   :  { %3505 = vrcp.f32 %v2252_v31 }
 0x8bd   :  { %v3492_v57 = vpop.eup %3491 }
 0x8be   :  { %v3494_v58 = vpop.eup %3493 }
 0x8bf   :  { %v3496_v55 = vpop.eup %3495 }
 0x8c0   :  { %v3498_v22 = vpop.eup %3497  ;;  %v2279_v60 = vmul.f32 %v3496_v55, %v3492_v57 }
 0x8c1   :  { %v3500_v63 = vpop.eup %3499  ;;  %v2278_v18 = vmul.f32 %v3498_v22, %v3494_v58 }
 0x8c2   :  { %2283 = vst [vmem:[#allocation5 + $0x8] sm:$0xff] %v2279_v60 }
 0x8c3   :  { %v3502_v20 = vpop.eup %3501  ;;  %2282 = vst [vmem:[#allocation5] sm:$0xff] %v2278_v18 }
 0x8c4   :  { %v3504_v56 = vpop.eup %3503  ;;  %v2281_v29 = vmul.f32 %v3502_v20, %v3500_v63 }
 0x8c5   :  { %v3506_v27 = vpop.eup %3505 }
 0x8c6   :  { %v2280_v21 = vmul.f32 %v3506_v27, %v3504_v56  ;;  %2285 = vst [vmem:[#allocation5 + $0x18] sm:$0xff] %v2281_v29 }
 0x8c8   :  { %2284 = vst [vmem:[#allocation5 + $0x10] sm:$0xff] %v2280_v21 }
 0x8c9   :  { %3571 = shalt.err (!%p3568_p12)
}
 0x8ca   :  { %s3572_s11 = scalar_lea.hbm %s4241_s2, 512 }
 0x8cb   :  { %p3573_p13 = scmp.ne.s32.totalorder %s4241_s2, %s3572_s11  ;;  %p3576_p0 = scmp.lt.u32.totalorder %s3572_s11, %s4241_s2 }
 0x8cd   :  { %p3578_p1 = pnand %p3576_p0, %p3573_p13 }
 0x8cf   :  { %3581 = shalt.err (!%p3578_p1)
}
 0x8d0   :  { %2297 = dma.vmem_to_hbm [thread:$0]  %s2292_s7, 512, %s4241_s2, [#allocation4], %s3587_s19, %s3587_s19, %s3588_s20  }
 0x8d1   :  { %3584 = dma.done.wait [#allocation4], 512  }
 0x8d2   :  { %3585 = vsyncadd [#allocation4], 4294966784 }
 0x8d3   :  { %2301 = vsyncpa [#allocation3], 1 }
 0x8d4   :  { %2302 = vsyncpa [#allocation4], 1 }

</bundles_post_ra>
